<compile_context>
chip_gen: v7x
topology: tpu7x:2x2x1
jax: 0.10.0
libtpu: 0.0.40
codegen_flags: <defaults>
</compile_context>

<pallas_src>
import math
from functools import partial

import jax
import jax.numpy as jnp
from jax.experimental import pallas as pl
from jax.experimental.pallas import tpu as pltpu


HEAD_PAD = 128   # hiddens_to_z0 hidden width 50 -> padded to 128 lanes
OUT_PAD = 128    # output width 2*latent_dim    -> padded to 128 lanes
PACK_W = 128     # lane width of the packed weight operand


def _pack_weights(pieces):
    """Pack small 2-D weight/bias arrays into one (rows, 128) f32 array.

    Each piece starts at an 8-aligned row offset (so in-kernel slices never
    straddle a sublane tile) and occupies columns [0:ncols).
    Returns (packed_array, {name: (row0, nrows, ncols)}).
    """
    offs = {}
    blocks = []
    row = 0
    for name, arr in pieces:
        r, c = arr.shape
        rpad = -(-r // 8) * 8
        offs[name] = (row, r, c)
        blocks.append(jnp.pad(arr.astype(jnp.float32),
                              ((0, rpad - r), (0, PACK_W - c))))
        row += rpad
    return jnp.concatenate(blocks, axis=0), offs


def _make_kernel(offs, *, R, B, T, V, E, H):
    D = V // 2
    H2, H3, H5 = 2 * H, 3 * H, 5 * H
    f32 = jnp.float32
    inv_sqrt_e = 1.0 / math.sqrt(E)

    def kernel(q_ref, kT_ref, x_ref, wpk_ref, out_ref, hid_ref):
        def w(name):
            r0, nr, nc = offs[name]
            return wpk_ref[r0:r0 + nr, 0:nc]

        # ---- attention time-embedding projections (biases folded host-side
        #      into augmented weights; k passed pre-transposed: all NN matmuls)
        q = jnp.dot(q_ref[...], w("wq"), preferred_element_type=f32)        # (R, E)
        kT = jnp.dot(w("wkT"), kT_ref[...], preferred_element_type=f32)     # (E, B*T)
        scores = jnp.dot(q, kT, preferred_element_type=f32) * inv_sqrt_e    # (R, B*T)

        # ---- per-channel masked softmax + weighted value sum as MXU matmuls:
        #      e = exp(s - rowmax) on the (R,T) slab, [num|den] = e @ [mask*x|mask]
        x = x_ref[...]
        nd_rows = []
        for b in range(B):                      # B is a compile-time constant
            s_b = scores[:, b * T:(b + 1) * T]                               # (R, T)
            e_b = jnp.exp(s_b - jnp.max(s_b, axis=1, keepdims=True))
            obs = x[b, :, D:]                                                # (T, D)
            m_b = jnp.concatenate([obs, obs], axis=1)                        # (T, V)
            mv_b = jnp.concatenate([m_b * x[b], m_b], axis=1)                # (T, 2V)
            nd_rows.append(jnp.dot(e_b, mv_b, preferred_element_type=f32))   # (R, 2V)
        nd = nd_rows[0] if B == 1 else jnp.concatenate(nd_rows, axis=0)      # (B*R, 2V)
        # all-unobserved channel: num = den = 0 -> att = 0 (reference's uniform
        # fallback averages the zeroed values, also 0 for standard mTAN inputs).
        att = nd[:, :V] / jnp.maximum(nd[:, V:], 1e-30)                      # (B*R, V) batch-major

        # ---- fused GRU input gates for BOTH directions in one matmul
        #      (attention output projection already folded into W_gates) ----
        gx_bm = jnp.dot(att, w("Wg"), preferred_element_type=f32) + w("bg")  # (B*R, 6H)
        # reorder rows batch-major -> time-major with a 0/1 permutation matmul
        gx = jnp.dot(w("ptm"), gx_bm, preferred_element_type=f32)            # row = t*B + b

        # ---- interleaved bidirectional GRU recurrence (fully unrolled) -----
        whbd = w("whbd")                        # (2H, 6H) block-diag [whf | whb]
        bhn = w("bhn")                          # (1, 2H)  [b_hn fwd | b_hn bwd]
        bhnf, bhnb = bhn[:, :H], bhn[:, H:]
        hf = jnp.zeros((B, H), f32)
        hb = jnp.zeros((B, H), f32)
        for i in range(R):                      # R is a compile-time constant
            j = R - 1 - i
            gh = jnp.dot(jnp.concatenate([hf, hb], axis=1), whbd,
                         preferred_element_type=f32)                         # (B, 6H)
            gxf = gx[i * B:(i + 1) * B, :]      # contiguous time-major slabs
            gxb = gx[j * B:(j + 1) * B, :]
            # forward direction, time i
            rzf = jax.nn.sigmoid(gxf[:, :H2] + gh[:, :H2])
            nf = jnp.tanh(gxf[:, H2:H3] + rzf[:, :H] * (gh[:, H2:H3] + bhnf))
            hf = (1.0 - rzf[:, H:]) * nf + rzf[:, H:] * hf
            # backward direction, time R-1-i
            rzb = jax.nn.sigmoid(gxb[:, H3:H5] + gh[:, H3:H5])
            nb = jnp.tanh(gxb[:, H5:] + rzb[:, :H] * (gh[:, H5:] + bhnb))
            hb = (1.0 - rzb[:, H:]) * nb + rzb[:, H:] * hb
            hid_ref[i * B:(i + 1) * B, :H] = hf
            hid_ref[j * B:(j + 1) * B, H:] = hb

        # ---- head: rows back to batch-major (permutation matmul), then MLP -
        head_in = jnp.dot(w("pbm"), hid_ref[...], preferred_element_type=f32)  # (B*R, 2H)
        a1 = jnp.maximum(
            jnp.dot(head_in, w("w1"), preferred_element_type=f32) + w("b1"), 0.0)
        out_ref[...] = jnp.dot(a1, w("w2"), preferred_element_type=f32) + w("b2")

    return kernel


def fixed_time_embedding(pos, d_model):
    """JAX port of enc_mtan_rnn.fixed_time_embedding (learn_emb=False path)."""
    position = 48.0 * pos[..., None]
    div_term = jnp.exp(jnp.arange(0, d_model, 2, dtype=jnp.float32)
                       * (-(math.log(10.0) / d_model)))
    sin = jnp.sin(position * div_term)
    cos = jnp.cos(position * div_term)
    return jnp.stack([sin, cos], axis=-1).reshape(pos.shape + (d_model,))


@partial(jax.jit, static_argnames=("input_dim", "embed_time", "nhidden", "latent_dim"))
def enc_mtan_rnn_forward(x, time_steps, query_pts, params, *,
                         input_dim, embed_time, nhidden, latent_dim):
    """x: (B, T, 2*input_dim), time_steps: (B, T), query_pts: (R,).
    Returns (B, R, 2*latent_dim)."""
    B, T, V = x.shape
    assert V == 2 * input_dim
    R = query_pts.shape[0]
    E, H = embed_time, nhidden
    out_dim = 2 * latent_dim
    p = params
    f32 = jnp.float32

    # ---- data prep (layout only): sinusoidal embeddings, augmented with a
    #      ones column/row so the q/k projection biases fold into the weights
    EA = -(-(E + 1) // 8) * 8
    k_emb = fixed_time_embedding(time_steps, E).reshape(B * T, E)
    q_emb = fixed_time_embedding(query_pts[None, :], E)[0]                   # (R, E)
    q_aug = jnp.concatenate(
        [q_emb, jnp.ones((R, 1), f32), jnp.zeros((R, EA - E - 1), f32)], axis=1)
    kT_aug = jnp.concatenate(
        [k_emb.T, jnp.ones((1, B * T), f32),
         jnp.zeros((EA - E - 1, B * T), f32)], axis=0)

    # ---- fold biases / fuse projections host-side (exact linear algebra) ----
    wq_aug = jnp.concatenate(
        [p["att_wq"], p["att_bq"][None, :], jnp.zeros((EA - E - 1, E), f32)], axis=0)
    wkT_aug = jnp.concatenate(
        [p["att_wk"].T, p["att_bk"][:, None], jnp.zeros((E, EA - E - 1), f32)], axis=1)

    wi_cat = jnp.concatenate([p["gru_wif"], p["gru_wib"]], axis=1)           # (H, 6H)
    Wg = p["att_wo"] @ wi_cat                                                # (V, 6H)

    def fold_rz(bi, bh):   # r/z hidden biases folded into the input bias
        return bi + jnp.concatenate([bh[:H], bh[H:2 * H], jnp.zeros((H,), f32)])

    bg = (p["att_bo"] @ wi_cat
          + jnp.concatenate([fold_rz(p["gru_bif"], p["gru_bhf"]),
                             fold_rz(p["gru_bib"], p["gru_bhb"])]))[None, :]  # (1, 6H)

    whbd = jnp.zeros((2 * H, 6 * H), f32)
    whbd = whbd.at[:H, :3 * H].set(p["gru_whf"]).at[H:, 3 * H:].set(p["gru_whb"])
    bhn = jnp.concatenate([p["gru_bhf"][2 * H:], p["gru_bhb"][2 * H:]])[None, :]

    hw = p["head_w1"].shape[1]
    w1p = jnp.pad(p["head_w1"], ((0, 0), (0, HEAD_PAD - hw)))
    b1p = jnp.pad(p["head_b1"], (0, HEAD_PAD - hw))[None, :]
    w2p = jnp.pad(p["head_w2"], ((0, HEAD_PAD - hw), (0, OUT_PAD - out_dim)))
    b2p = jnp.pad(p["head_b2"], (0, OUT_PAD - out_dim))[None, :]

    # 0/1 permutation matrices: batch-major <-> time-major row order
    idx = jnp.arange(R * B)
    ptm = jax.nn.one_hot((idx % B) * R + idx // B, R * B, dtype=f32)  # time  <- batch
    pbm = jax.nn.one_hot((idx % R) * B + idx // R, R * B, dtype=f32)  # batch <- time

    wpack, offs = _pack_weights([
        ("wq", wq_aug), ("wkT", wkT_aug), ("Wg", Wg), ("whbd", whbd),
        ("w1", w1p), ("w2", w2p), ("ptm", ptm), ("pbm", pbm),
        ("bg", bg), ("bhn", bhn), ("b1", b1p), ("b2", b2p),
    ])

    kernel = _make_kernel(offs, R=R, B=B, T=T, V=V, E=E, H=H)
    vmem = pl.BlockSpec(memory_space=pltpu.MemorySpace.VMEM)
    # Single gridless invocation: total footprint ~0.2 MiB, far under VMEM on
    # every generation (v5e/v6e 128 MiB, v7x 64 MiB).
    out2d = pl.pallas_call(
        kernel,
        out_shape=jax.ShapeDtypeStruct((B * R, OUT_PAD), jnp.float32),
        in_specs=[vmem, vmem, vmem, vmem],
        out_specs=vmem,
        scratch_shapes=[pltpu.VMEM((R * B, 2 * H), jnp.float32)],
    )(q_aug, kT_aug, x, wpack)
    # rows are batch-major (b*R + t): only a free reshape + lane slice remain.
    return out2d.reshape(B, R, OUT_PAD)[:, :, :out_dim]


def init_params(key, input_dim, nhidden=16, embed_time=16, latent_dim=2):
    """Deterministic PyTorch-style uniform init; weights stored as (in, out);
    GRU gate weights pre-fused to (in, 3H) with column order [r | z | n]."""
    V = 2 * input_dim
    H = nhidden
    E = embed_time
    ks = jax.random.split(key, 18)

    def u(k, shape, fan_in):
        b = 1.0 / math.sqrt(fan_in)
        return jax.random.uniform(k, shape, jnp.float32, -b, b)

    return {
        "att_wq": u(ks[0], (E, E), E), "att_bq": u(ks[1], (E,), E),
        "att_wk": u(ks[2], (E, E), E), "att_bk": u(ks[3], (E,), E),
        "att_wo": u(ks[4], (V, H), V), "att_bo": u(ks[5], (H,), V),
        "gru_wif": u(ks[6], (H, 3 * H), H), "gru_whf": u(ks[7], (H, 3 * H), H),
        "gru_bif": u(ks[8], (3 * H,), H), "gru_bhf": u(ks[9], (3 * H,), H),
        "gru_wib": u(ks[10], (H, 3 * H), H), "gru_whb": u(ks[11], (H, 3 * H), H),
        "gru_bib": u(ks[12], (3 * H,), H), "gru_bhb": u(ks[13], (3 * H,), H),
        "head_w1": u(ks[14], (2 * H, 50), 2 * H), "head_b1": u(ks[15], (50,), 2 * H),
        "head_w2": u(ks[16], (50, 2 * latent_dim), 50),
        "head_b2": u(ks[17], (2 * latent_dim,), 50),
    }


def reference_forward(x, time_steps, query_pts, p, *,
                      input_dim, embed_time, nhidden, latent_dim):
    """Pure-JAX reference mirroring the PyTorch forward (num_heads=1, fixed emb)."""
    B, T, V = x.shape
    E, H = embed_time, nhidden
    obs_mask = x[:, :, input_dim:]
    mask = jnp.concatenate([obs_mask, obs_mask], axis=2)              # (B, T, V)
    key = fixed_time_embedding(time_steps, E)                         # (B, T, E)
    query = fixed_time_embedding(query_pts[None, :], E)               # (1, R, E)

    q = query @ p["att_wq"] + p["att_bq"]                             # (1, R, E)
    k = key @ p["att_wk"] + p["att_bk"]                               # (B, T, E)
    scores = jnp.einsum("ore,bte->brt", q, k) / math.sqrt(E)          # (B, R, T)
    scores = jnp.repeat(scores[..., None], V, axis=-1)                # (B, R, T, V)
    scores = jnp.where(mask[:, None, :, :] == 0, -1e9, scores)
    p_attn = jax.nn.softmax(scores, axis=-2)
    att = jnp.sum(p_attn * x[:, None, :, :], axis=-2)                 # (B, R, V)
    attn_out = att @ p["att_wo"] + p["att_bo"]                        # (B, R, Hn)
    R = attn_out.shape[1]

    def gru_dir(wi, wh, bi, bh, reverse):
        h = jnp.zeros((B, H), jnp.float32)
        outs = [None] * R
        order = reversed(range(R)) if reverse else range(R)
        for t in order:
            x_t = attn_out[:, t, :]
            gx = x_t @ wi + bi
            gh = h @ wh + bh
            r = jax.nn.sigmoid(gx[:, :H] + gh[:, :H])
            z = jax.nn.sigmoid(gx[:, H:2 * H] + gh[:, H:2 * H])
            n = jnp.tanh(gx[:, 2 * H:] + r * gh[:, 2 * H:])
            h = (1.0 - z) * n + z * h
            outs[t] = h
        return jnp.stack(outs, axis=1)                                # (B, R, H)

    hf = gru_dir(p["gru_wif"], p["gru_whf"], p["gru_bif"], p["gru_bhf"], False)
    hb = gru_dir(p["gru_wib"], p["gru_whb"], p["gru_bib"], p["gru_bhb"], True)
    hbi = jnp.concatenate([hf, hb], axis=-1)                          # (B, R, 2H)
    a1 = jnp.maximum(hbi @ p["head_w1"] + p["head_b1"], 0.0)
    return a1 @ p["head_w2"] + p["head_b2"]                           # (B, R, 2L)


if __name__ == "__main__":
    input_dim, embed_time, nhidden, latent_dim = 4, 16, 16, 2
    B, T, R = 2, 16, 8

    key = jax.random.PRNGKey(0)
    kx, km, kt, kp = jax.random.split(key, 4)
    vals = jax.random.normal(kx, (B, T, input_dim), jnp.float32)
    obs_mask = (jax.random.uniform(km, (B, T, input_dim)) > 0.3).astype(jnp.float32)
    x = jnp.concatenate([vals * obs_mask, obs_mask], axis=2)          # (B, T, 2*input_dim)
    time_steps = jnp.sort(jax.random.uniform(kt, (B, T)), axis=1)
    query_pts = jnp.linspace(0.0, 1.0, R)

    params = init_params(kp, input_dim, nhidden, embed_time, latent_dim)

    out = enc_mtan_rnn_forward(x, time_steps, query_pts, params,
                               input_dim=input_dim, embed_time=embed_time,
                               nhidden=nhidden, latent_dim=latent_dim)
    out = jax.block_until_ready(out)

    ref = reference_forward(x, time_steps, query_pts, params,
                            input_dim=input_dim, embed_time=embed_time,
                            nhidden=nhidden, latent_dim=latent_dim)
    assert out.shape == (B, R, 2 * latent_dim), out.shape
    max_err = float(jnp.max(jnp.abs(out - ref)))
    assert jnp.allclose(out, ref, rtol=1e-3, atol=2e-4), f"max abs err {max_err}"
    print("KERNEL_OK")
</pallas_src>

<mosaic_0001>
module attributes {stable_mosaic.version = 11 : i64} {
  func.func @kernel(%arg0: memref<8x24xf32, #tpu.memory_space<vmem>>, %arg1: memref<24x32xf32, #tpu.memory_space<vmem>>, %arg2: memref<2x16x8xf32, #tpu.memory_space<vmem>>, %arg3: memref<304x128xf32, #tpu.memory_space<vmem>>, %arg4: memref<16x128xf32, #tpu.memory_space<vmem>>, %arg5: memref<16x32xf32, #tpu.memory_space<vmem>>) attributes {dimension_semantics = [], scalar_prefetch = 0 : i64, scratch_operands = 1 : i64, tpu.core_type = #tpu.core_type<tc>} {
    %c0 = arith.constant 0 : index
    %c0_0 = arith.constant 0 : index
    %0 = vector.load %arg0[%c0, %c0_0] : memref<8x24xf32, #tpu.memory_space<vmem>>, vector<8x24xf32>
    %c0_1 = arith.constant 0 : index
    %c0_2 = arith.constant 0 : index
    %1 = vector.load %arg3[%c0_1, %c0_2] : memref<304x128xf32, #tpu.memory_space<vmem>>, vector<24x16xf32>
    %cst = arith.constant dense<0.000000e+00> : vector<8x16xf32>
    %2 = tpu.matmul %0, %1, %cst {dimension_numbers = #tpu.dot_dimension_numbers<[1], [0], [0], [1], [0, 0, 1, 1], [], []>} : vector<8x24xf32>, vector<24x16xf32>, vector<8x16xf32> -> vector<8x16xf32>
    %c24 = arith.constant 24 : index
    %c0_3 = arith.constant 0 : index
    %3 = vector.load %arg3[%c24, %c0_3] : memref<304x128xf32, #tpu.memory_space<vmem>>, vector<16x24xf32>
    %c0_4 = arith.constant 0 : index
    %c0_5 = arith.constant 0 : index
    %4 = vector.load %arg1[%c0_4, %c0_5] : memref<24x32xf32, #tpu.memory_space<vmem>>, vector<24x32xf32>
    %cst_6 = arith.constant dense<0.000000e+00> : vector<16x32xf32>
    %5 = tpu.matmul %3, %4, %cst_6 {dimension_numbers = #tpu.dot_dimension_numbers<[1], [0], [0], [1], [0, 0, 1, 1], [], []>} : vector<16x24xf32>, vector<24x32xf32>, vector<16x32xf32> -> vector<16x32xf32>
    %cst_7 = arith.constant dense<0.000000e+00> : vector<8x32xf32>
    %6 = tpu.matmul %2, %5, %cst_7 {dimension_numbers = #tpu.dot_dimension_numbers<[1], [0], [0], [1], [0, 0, 1, 1], [], []>} : vector<8x16xf32>, vector<16x32xf32>, vector<8x32xf32> -> vector<8x32xf32>
    %cst_8 = arith.constant 2.500000e-01 : f32
    %7 = vector.broadcast %cst_8 : f32 to vector<8x32xf32>
    %8 = arith.mulf %6, %7 : vector<8x32xf32>
    %c0_9 = arith.constant 0 : index
    %c0_10 = arith.constant 0 : index
    %c0_11 = arith.constant 0 : index
    %9 = vector.load %arg2[%c0_9, %c0_10, %c0_11] : memref<2x16x8xf32, #tpu.memory_space<vmem>>, vector<2x16x8xf32>
    %10 = vector.extract_strided_slice %8 {offsets = [0, 0], sizes = [8, 16], strides = [1, 1]} : vector<8x32xf32> to vector<8x16xf32>
    %cst_12 = arith.constant dense<0xFF800000> : vector<8xf32>
    %11 = vector.multi_reduction <maximumf>, %10, %cst_12 [1] : vector<8x16xf32> to vector<8xf32>
    %12 = vector.shape_cast %11 : vector<8xf32> to vector<8x1xf32>
    %13 = vector.broadcast %12 : vector<8x1xf32> to vector<8x16xf32>
    %14 = arith.subf %10, %13 : vector<8x16xf32>
    %15 = math.exp %14 : vector<8x16xf32>
    %16 = vector.extract_strided_slice %9 {offsets = [0, 0, 4], sizes = [1, 16, 4], strides = [1, 1, 1]} : vector<2x16x8xf32> to vector<1x16x4xf32>
    %17 = vector.shape_cast %16 : vector<1x16x4xf32> to vector<16x4xf32>
    %18 = tpu.concatenate %17, %17 in 1 : vector<16x4xf32>, vector<16x4xf32> -> vector<16x8xf32>
    %19 = vector.extract_strided_slice %9 {offsets = [0, 0, 0], sizes = [1, 16, 8], strides = [1, 1, 1]} : vector<2x16x8xf32> to vector<1x16x8xf32>
    %20 = vector.shape_cast %19 : vector<1x16x8xf32> to vector<16x8xf32>
    %21 = arith.mulf %18, %20 : vector<16x8xf32>
    %22 = tpu.concatenate %21, %18 in 1 : vector<16x8xf32>, vector<16x8xf32> -> vector<16x16xf32>
    %cst_13 = arith.constant dense<0.000000e+00> : vector<8x16xf32>
    %23 = tpu.matmul %15, %22, %cst_13 {dimension_numbers = #tpu.dot_dimension_numbers<[1], [0], [0], [1], [0, 0, 1, 1], [], []>} : vector<8x16xf32>, vector<16x16xf32>, vector<8x16xf32> -> vector<8x16xf32>
    %24 = vector.extract_strided_slice %8 {offsets = [0, 16], sizes = [8, 16], strides = [1, 1]} : vector<8x32xf32> to vector<8x16xf32>
    %cst_14 = arith.constant dense<0xFF800000> : vector<8xf32>
    %25 = vector.multi_reduction <maximumf>, %24, %cst_14 [1] : vector<8x16xf32> to vector<8xf32>
    %26 = vector.shape_cast %25 : vector<8xf32> to vector<8x1xf32>
    %27 = vector.broadcast %26 : vector<8x1xf32> to vector<8x16xf32>
    %28 = arith.subf %24, %27 : vector<8x16xf32>
    %29 = math.exp %28 : vector<8x16xf32>
    %30 = vector.extract_strided_slice %9 {offsets = [1, 0, 4], sizes = [1, 16, 4], strides = [1, 1, 1]} : vector<2x16x8xf32> to vector<1x16x4xf32>
    %31 = vector.shape_cast %30 : vector<1x16x4xf32> to vector<16x4xf32>
    %32 = tpu.concatenate %31, %31 in 1 : vector<16x4xf32>, vector<16x4xf32> -> vector<16x8xf32>
    %33 = vector.extract_strided_slice %9 {offsets = [1, 0, 0], sizes = [1, 16, 8], strides = [1, 1, 1]} : vector<2x16x8xf32> to vector<1x16x8xf32>
    %34 = vector.shape_cast %33 : vector<1x16x8xf32> to vector<16x8xf32>
    %35 = arith.mulf %32, %34 : vector<16x8xf32>
    %36 = tpu.concatenate %35, %32 in 1 : vector<16x8xf32>, vector<16x8xf32> -> vector<16x16xf32>
    %cst_15 = arith.constant dense<0.000000e+00> : vector<8x16xf32>
    %37 = tpu.matmul %29, %36, %cst_15 {dimension_numbers = #tpu.dot_dimension_numbers<[1], [0], [0], [1], [0, 0, 1, 1], [], []>} : vector<8x16xf32>, vector<16x16xf32>, vector<8x16xf32> -> vector<8x16xf32>
    %38 = tpu.concatenate %23, %37 in 0 : vector<8x16xf32>, vector<8x16xf32> -> vector<16x16xf32>
    %39 = vector.extract_strided_slice %38 {offsets = [0, 0], sizes = [16, 8], strides = [1, 1]} : vector<16x16xf32> to vector<16x8xf32>
    %40 = vector.extract_strided_slice %38 {offsets = [0, 8], sizes = [16, 8], strides = [1, 1]} : vector<16x16xf32> to vector<16x8xf32>
    %cst_16 = arith.constant 1.000000e-30 : f32
    %41 = vector.broadcast %cst_16 : f32 to vector<16x8xf32>
    %42 = arith.maximumf %40, %41 : vector<16x8xf32>
    %43 = arith.divf %39, %42 : vector<16x8xf32>
    %c40 = arith.constant 40 : index
    %c0_17 = arith.constant 0 : index
    %44 = vector.load %arg3[%c40, %c0_17] : memref<304x128xf32, #tpu.memory_space<vmem>>, vector<8x96xf32>
    %cst_18 = arith.constant dense<0.000000e+00> : vector<16x96xf32>
    %45 = tpu.matmul %43, %44, %cst_18 {dimension_numbers = #tpu.dot_dimension_numbers<[1], [0], [0], [1], [0, 0, 1, 1], [], []>} : vector<16x8xf32>, vector<8x96xf32>, vector<16x96xf32> -> vector<16x96xf32>
    %c272 = arith.constant 272 : index
    %c0_19 = arith.constant 0 : index
    %46 = vector.load %arg3[%c272, %c0_19] : memref<304x128xf32, #tpu.memory_space<vmem>>, vector<1x96xf32>
    %47 = vector.broadcast %46 : vector<1x96xf32> to vector<16x96xf32>
    %48 = arith.addf %45, %47 : vector<16x96xf32>
    %c240 = arith.constant 240 : index
    %c0_20 = arith.constant 0 : index
    %49 = vector.load %arg3[%c240, %c0_20] : memref<304x128xf32, #tpu.memory_space<vmem>>, vector<16x16xf32>
    %cst_21 = arith.constant dense<0.000000e+00> : vector<16x96xf32>
    %50 = tpu.matmul %49, %48, %cst_21 {dimension_numbers = #tpu.dot_dimension_numbers<[1], [0], [0], [1], [0, 0, 1, 1], [], []>} : vector<16x16xf32>, vector<16x96xf32>, vector<16x96xf32> -> vector<16x96xf32>
    %c48 = arith.constant 48 : index
    %c0_22 = arith.constant 0 : index
    %51 = vector.load %arg3[%c48, %c0_22] : memref<304x128xf32, #tpu.memory_space<vmem>>, vector<32x96xf32>
    %c280 = arith.constant 280 : index
    %c0_23 = arith.constant 0 : index
    %52 = vector.load %arg3[%c280, %c0_23] : memref<304x128xf32, #tpu.memory_space<vmem>>, vector<1x32xf32>
    %53 = vector.extract_strided_slice %52 {offsets = [0, 0], sizes = [1, 16], strides = [1, 1]} : vector<1x32xf32> to vector<1x16xf32>
    %54 = vector.extract_strided_slice %52 {offsets = [0, 16], sizes = [1, 16], strides = [1, 1]} : vector<1x32xf32> to vector<1x16xf32>
    %cst_24 = arith.constant 0.000000e+00 : f32
    %55 = vector.broadcast %cst_24 : f32 to vector<2x16xf32>
    %cst_25 = arith.constant 0.000000e+00 : f32
    %56 = vector.broadcast %cst_25 : f32 to vector<2x16xf32>
    %57 = tpu.concatenate %55, %56 in 1 : vector<2x16xf32>, vector<2x16xf32> -> vector<2x32xf32>
    %cst_26 = arith.constant dense<0.000000e+00> : vector<2x96xf32>
    %58 = tpu.matmul %57, %51, %cst_26 {dimension_numbers = #tpu.dot_dimension_numbers<[1], [0], [0], [1], [0, 0, 1, 1], [], []>} : vector<2x32xf32>, vector<32x96xf32>, vector<2x96xf32> -> vector<2x96xf32>
    %59 = vector.extract_strided_slice %50 {offsets = [0, 0], sizes = [2, 96], strides = [1, 1]} : vector<16x96xf32> to vector<2x96xf32>
    %60 = vector.extract_strided_slice %50 {offsets = [14, 0], sizes = [2, 96], strides = [1, 1]} : vector<16x96xf32> to vector<2x96xf32>
    %61 = vector.extract_strided_slice %59 {offsets = [0, 0], sizes = [2, 32], strides = [1, 1]} : vector<2x96xf32> to vector<2x32xf32>
    %62 = vector.extract_strided_slice %58 {offsets = [0, 0], sizes = [2, 32], strides = [1, 1]} : vector<2x96xf32> to vector<2x32xf32>
    %63 = arith.addf %61, %62 : vector<2x32xf32>
    %64 = arith.negf %63 : vector<2x32xf32>
    %65 = math.exp %64 : vector<2x32xf32>
    %cst_27 = arith.constant 1.000000e+00 : f32
    %66 = vector.broadcast %cst_27 : f32 to vector<2x32xf32>
    %67 = arith.addf %66, %65 : vector<2x32xf32>
    %68 = arith.divf %66, %67 : vector<2x32xf32>
    %69 = vector.extract_strided_slice %59 {offsets = [0, 32], sizes = [2, 16], strides = [1, 1]} : vector<2x96xf32> to vector<2x16xf32>
    %70 = vector.extract_strided_slice %68 {offsets = [0, 0], sizes = [2, 16], strides = [1, 1]} : vector<2x32xf32> to vector<2x16xf32>
    %71 = vector.extract_strided_slice %58 {offsets = [0, 32], sizes = [2, 16], strides = [1, 1]} : vector<2x96xf32> to vector<2x16xf32>
    %72 = vector.broadcast %53 : vector<1x16xf32> to vector<2x16xf32>
    %73 = arith.addf %71, %72 : vector<2x16xf32>
    %74 = arith.mulf %70, %73 : vector<2x16xf32>
    %75 = arith.addf %69, %74 : vector<2x16xf32>
    %76 = math.tanh %75 : vector<2x16xf32>
    %77 = vector.extract_strided_slice %68 {offsets = [0, 16], sizes = [2, 16], strides = [1, 1]} : vector<2x32xf32> to vector<2x16xf32>
    %cst_28 = arith.constant 1.000000e+00 : f32
    %78 = vector.broadcast %cst_28 : f32 to vector<2x16xf32>
    %79 = arith.subf %78, %77 : vector<2x16xf32>
    %80 = arith.mulf %79, %76 : vector<2x16xf32>
    %81 = vector.extract_strided_slice %68 {offsets = [0, 16], sizes = [2, 16], strides = [1, 1]} : vector<2x32xf32> to vector<2x16xf32>
    %82 = arith.mulf %81, %55 : vector<2x16xf32>
    %83 = arith.addf %80, %82 : vector<2x16xf32>
    %84 = vector.extract_strided_slice %60 {offsets = [0, 48], sizes = [2, 32], strides = [1, 1]} : vector<2x96xf32> to vector<2x32xf32>
    %85 = vector.extract_strided_slice %58 {offsets = [0, 48], sizes = [2, 32], strides = [1, 1]} : vector<2x96xf32> to vector<2x32xf32>
    %86 = arith.addf %84, %85 : vector<2x32xf32>
    %87 = arith.negf %86 : vector<2x32xf32>
    %88 = math.exp %87 : vector<2x32xf32>
    %cst_29 = arith.constant 1.000000e+00 : f32
    %89 = vector.broadcast %cst_29 : f32 to vector<2x32xf32>
    %90 = arith.addf %89, %88 : vector<2x32xf32>
    %91 = arith.divf %89, %90 : vector<2x32xf32>
    %92 = vector.extract_strided_slice %60 {offsets = [0, 80], sizes = [2, 16], strides = [1, 1]} : vector<2x96xf32> to vector<2x16xf32>
    %93 = vector.extract_strided_slice %91 {offsets = [0, 0], sizes = [2, 16], strides = [1, 1]} : vector<2x32xf32> to vector<2x16xf32>
    %94 = vector.extract_strided_slice %58 {offsets = [0, 80], sizes = [2, 16], strides = [1, 1]} : vector<2x96xf32> to vector<2x16xf32>
    %95 = vector.broadcast %54 : vector<1x16xf32> to vector<2x16xf32>
    %96 = arith.addf %94, %95 : vector<2x16xf32>
    %97 = arith.mulf %93, %96 : vector<2x16xf32>
    %98 = arith.addf %92, %97 : vector<2x16xf32>
    %99 = math.tanh %98 : vector<2x16xf32>
    %100 = vector.extract_strided_slice %91 {offsets = [0, 16], sizes = [2, 16], strides = [1, 1]} : vector<2x32xf32> to vector<2x16xf32>
    %cst_30 = arith.constant 1.000000e+00 : f32
    %101 = vector.broadcast %cst_30 : f32 to vector<2x16xf32>
    %102 = arith.subf %101, %100 : vector<2x16xf32>
    %103 = arith.mulf %102, %99 : vector<2x16xf32>
    %104 = vector.extract_strided_slice %91 {offsets = [0, 16], sizes = [2, 16], strides = [1, 1]} : vector<2x32xf32> to vector<2x16xf32>
    %105 = arith.mulf %104, %56 : vector<2x16xf32>
    %106 = arith.addf %103, %105 : vector<2x16xf32>
    %c0_31 = arith.constant 0 : index
    %c0_32 = arith.constant 0 : index
    %107 = vector.load %arg5[%c0_31, %c0_32] : memref<16x32xf32, #tpu.memory_space<vmem>>, vector<2x16xf32>
    tpu.vector_store %arg5[%c0_31, %c0_32], %83 {strides = array<i32>} : memref<16x32xf32, #tpu.memory_space<vmem>>, vector<2x16xf32>,
    %c14 = arith.constant 14 : index
    %c16 = arith.constant 16 : index
    %108 = vector.load %arg5[%c14, %c16] : memref<16x32xf32, #tpu.memory_space<vmem>>, vector<2x16xf32>
    tpu.vector_store %arg5[%c14, %c16], %106 {strides = array<i32>} : memref<16x32xf32, #tpu.memory_space<vmem>>, vector<2x16xf32>,
    %109 = tpu.concatenate %83, %106 in 1 : vector<2x16xf32>, vector<2x16xf32> -> vector<2x32xf32>
    %cst_33 = arith.constant dense<0.000000e+00> : vector<2x96xf32>
    %110 = tpu.matmul %109, %51, %cst_33 {dimension_numbers = #tpu.dot_dimension_numbers<[1], [0], [0], [1], [0, 0, 1, 1], [], []>} : vector<2x32xf32>, vector<32x96xf32>, vector<2x96xf32> -> vector<2x96xf32>
    %111 = vector.extract_strided_slice %50 {offsets = [2, 0], sizes = [2, 96], strides = [1, 1]} : vector<16x96xf32> to vector<2x96xf32>
    %112 = vector.extract_strided_slice %50 {offsets = [12, 0], sizes = [2, 96], strides = [1, 1]} : vector<16x96xf32> to vector<2x96xf32>
    %113 = vector.extract_strided_slice %111 {offsets = [0, 0], sizes = [2, 32], strides = [1, 1]} : vector<2x96xf32> to vector<2x32xf32>
    %114 = vector.extract_strided_slice %110 {offsets = [0, 0], sizes = [2, 32], strides = [1, 1]} : vector<2x96xf32> to vector<2x32xf32>
    %115 = arith.addf %113, %114 : vector<2x32xf32>
    %116 = arith.negf %115 : vector<2x32xf32>
    %117 = math.exp %116 : vector<2x32xf32>
    %cst_34 = arith.constant 1.000000e+00 : f32
    %118 = vector.broadcast %cst_34 : f32 to vector<2x32xf32>
    %119 = arith.addf %118, %117 : vector<2x32xf32>
    %120 = arith.divf %118, %119 : vector<2x32xf32>
    %121 = vector.extract_strided_slice %111 {offsets = [0, 32], sizes = [2, 16], strides = [1, 1]} : vector<2x96xf32> to vector<2x16xf32>
    %122 = vector.extract_strided_slice %120 {offsets = [0, 0], sizes = [2, 16], strides = [1, 1]} : vector<2x32xf32> to vector<2x16xf32>
    %123 = vector.extract_strided_slice %110 {offsets = [0, 32], sizes = [2, 16], strides = [1, 1]} : vector<2x96xf32> to vector<2x16xf32>
    %124 = vector.broadcast %53 : vector<1x16xf32> to vector<2x16xf32>
    %125 = arith.addf %123, %124 : vector<2x16xf32>
    %126 = arith.mulf %122, %125 : vector<2x16xf32>
    %127 = arith.addf %121, %126 : vector<2x16xf32>
    %128 = math.tanh %127 : vector<2x16xf32>
    %129 = vector.extract_strided_slice %120 {offsets = [0, 16], sizes = [2, 16], strides = [1, 1]} : vector<2x32xf32> to vector<2x16xf32>
    %cst_35 = arith.constant 1.000000e+00 : f32
    %130 = vector.broadcast %cst_35 : f32 to vector<2x16xf32>
    %131 = arith.subf %130, %129 : vector<2x16xf32>
    %132 = arith.mulf %131, %128 : vector<2x16xf32>
    %133 = vector.extract_strided_slice %120 {offsets = [0, 16], sizes = [2, 16], strides = [1, 1]} : vector<2x32xf32> to vector<2x16xf32>
    %134 = arith.mulf %133, %83 : vector<2x16xf32>
    %135 = arith.addf %132, %134 : vector<2x16xf32>
    %136 = vector.extract_strided_slice %112 {offsets = [0, 48], sizes = [2, 32], strides = [1, 1]} : vector<2x96xf32> to vector<2x32xf32>
    %137 = vector.extract_strided_slice %110 {offsets = [0, 48], sizes = [2, 32], strides = [1, 1]} : vector<2x96xf32> to vector<2x32xf32>
    %138 = arith.addf %136, %137 : vector<2x32xf32>
    %139 = arith.negf %138 : vector<2x32xf32>
    %140 = math.exp %139 : vector<2x32xf32>
    %cst_36 = arith.constant 1.000000e+00 : f32
    %141 = vector.broadcast %cst_36 : f32 to vector<2x32xf32>
    %142 = arith.addf %141, %140 : vector<2x32xf32>
    %143 = arith.divf %141, %142 : vector<2x32xf32>
    %144 = vector.extract_strided_slice %112 {offsets = [0, 80], sizes = [2, 16], strides = [1, 1]} : vector<2x96xf32> to vector<2x16xf32>
    %145 = vector.extract_strided_slice %143 {offsets = [0, 0], sizes = [2, 16], strides = [1, 1]} : vector<2x32xf32> to vector<2x16xf32>
    %146 = vector.extract_strided_slice %110 {offsets = [0, 80], sizes = [2, 16], strides = [1, 1]} : vector<2x96xf32> to vector<2x16xf32>
    %147 = vector.broadcast %54 : vector<1x16xf32> to vector<2x16xf32>
    %148 = arith.addf %146, %147 : vector<2x16xf32>
    %149 = arith.mulf %145, %148 : vector<2x16xf32>
    %150 = arith.addf %144, %149 : vector<2x16xf32>
    %151 = math.tanh %150 : vector<2x16xf32>
    %152 = vector.extract_strided_slice %143 {offsets = [0, 16], sizes = [2, 16], strides = [1, 1]} : vector<2x32xf32> to vector<2x16xf32>
    %cst_37 = arith.constant 1.000000e+00 : f32
    %153 = vector.broadcast %cst_37 : f32 to vector<2x16xf32>
    %154 = arith.subf %153, %152 : vector<2x16xf32>
    %155 = arith.mulf %154, %151 : vector<2x16xf32>
    %156 = vector.extract_strided_slice %143 {offsets = [0, 16], sizes = [2, 16], strides = [1, 1]} : vector<2x32xf32> to vector<2x16xf32>
    %157 = arith.mulf %156, %106 : vector<2x16xf32>
    %158 = arith.addf %155, %157 : vector<2x16xf32>
    %c2 = arith.constant 2 : index
    %c0_38 = arith.constant 0 : index
    %159 = vector.load %arg5[%c2, %c0_38] : memref<16x32xf32, #tpu.memory_space<vmem>>, vector<2x16xf32>
    tpu.vector_store %arg5[%c2, %c0_38], %135 {strides = array<i32>} : memref<16x32xf32, #tpu.memory_space<vmem>>, vector<2x16xf32>,
    %c12 = arith.constant 12 : index
    %c16_39 = arith.constant 16 : index
    %160 = vector.load %arg5[%c12, %c16_39] : memref<16x32xf32, #tpu.memory_space<vmem>>, vector<2x16xf32>
    tpu.vector_store %arg5[%c12, %c16_39], %158 {strides = array<i32>} : memref<16x32xf32, #tpu.memory_space<vmem>>, vector<2x16xf32>,
    %161 = tpu.concatenate %135, %158 in 1 : vector<2x16xf32>, vector<2x16xf32> -> vector<2x32xf32>
    %cst_40 = arith.constant dense<0.000000e+00> : vector<2x96xf32>
    %162 = tpu.matmul %161, %51, %cst_40 {dimension_numbers = #tpu.dot_dimension_numbers<[1], [0], [0], [1], [0, 0, 1, 1], [], []>} : vector<2x32xf32>, vector<32x96xf32>, vector<2x96xf32> -> vector<2x96xf32>
    %163 = vector.extract_strided_slice %50 {offsets = [4, 0], sizes = [2, 96], strides = [1, 1]} : vector<16x96xf32> to vector<2x96xf32>
    %164 = vector.extract_strided_slice %50 {offsets = [10, 0], sizes = [2, 96], strides = [1, 1]} : vector<16x96xf32> to vector<2x96xf32>
    %165 = vector.extract_strided_slice %163 {offsets = [0, 0], sizes = [2, 32], strides = [1, 1]} : vector<2x96xf32> to vector<2x32xf32>
    %166 = vector.extract_strided_slice %162 {offsets = [0, 0], sizes = [2, 32], strides = [1, 1]} : vector<2x96xf32> to vector<2x32xf32>
    %167 = arith.addf %165, %166 : vector<2x32xf32>
    %168 = arith.negf %167 : vector<2x32xf32>
    %169 = math.exp %168 : vector<2x32xf32>
    %cst_41 = arith.constant 1.000000e+00 : f32
    %170 = vector.broadcast %cst_41 : f32 to vector<2x32xf32>
    %171 = arith.addf %170, %169 : vector<2x32xf32>
    %172 = arith.divf %170, %171 : vector<2x32xf32>
    %173 = vector.extract_strided_slice %163 {offsets = [0, 32], sizes = [2, 16], strides = [1, 1]} : vector<2x96xf32> to vector<2x16xf32>
    %174 = vector.extract_strided_slice %172 {offsets = [0, 0], sizes = [2, 16], strides = [1, 1]} : vector<2x32xf32> to vector<2x16xf32>
    %175 = vector.extract_strided_slice %162 {offsets = [0, 32], sizes = [2, 16], strides = [1, 1]} : vector<2x96xf32> to vector<2x16xf32>
    %176 = vector.broadcast %53 : vector<1x16xf32> to vector<2x16xf32>
    %177 = arith.addf %175, %176 : vector<2x16xf32>
    %178 = arith.mulf %174, %177 : vector<2x16xf32>
    %179 = arith.addf %173, %178 : vector<2x16xf32>
    %180 = math.tanh %179 : vector<2x16xf32>
    %181 = vector.extract_strided_slice %172 {offsets = [0, 16], sizes = [2, 16], strides = [1, 1]} : vector<2x32xf32> to vector<2x16xf32>
    %cst_42 = arith.constant 1.000000e+00 : f32
    %182 = vector.broadcast %cst_42 : f32 to vector<2x16xf32>
    %183 = arith.subf %182, %181 : vector<2x16xf32>
    %184 = arith.mulf %183, %180 : vector<2x16xf32>
    %185 = vector.extract_strided_slice %172 {offsets = [0, 16], sizes = [2, 16], strides = [1, 1]} : vector<2x32xf32> to vector<2x16xf32>
    %186 = arith.mulf %185, %135 : vector<2x16xf32>
    %187 = arith.addf %184, %186 : vector<2x16xf32>
    %188 = vector.extract_strided_slice %164 {offsets = [0, 48], sizes = [2, 32], strides = [1, 1]} : vector<2x96xf32> to vector<2x32xf32>
    %189 = vector.extract_strided_slice %162 {offsets = [0, 48], sizes = [2, 32], strides = [1, 1]} : vector<2x96xf32> to vector<2x32xf32>
    %190 = arith.addf %188, %189 : vector<2x32xf32>
    %191 = arith.negf %190 : vector<2x32xf32>
    %192 = math.exp %191 : vector<2x32xf32>
    %cst_43 = arith.constant 1.000000e+00 : f32
    %193 = vector.broadcast %cst_43 : f32 to vector<2x32xf32>
    %194 = arith.addf %193, %192 : vector<2x32xf32>
    %195 = arith.divf %193, %194 : vector<2x32xf32>
    %196 = vector.extract_strided_slice %164 {offsets = [0, 80], sizes = [2, 16], strides = [1, 1]} : vector<2x96xf32> to vector<2x16xf32>
    %197 = vector.extract_strided_slice %195 {offsets = [0, 0], sizes = [2, 16], strides = [1, 1]} : vector<2x32xf32> to vector<2x16xf32>
    %198 = vector.extract_strided_slice %162 {offsets = [0, 80], sizes = [2, 16], strides = [1, 1]} : vector<2x96xf32> to vector<2x16xf32>
    %199 = vector.broadcast %54 : vector<1x16xf32> to vector<2x16xf32>
    %200 = arith.addf %198, %199 : vector<2x16xf32>
    %201 = arith.mulf %197, %200 : vector<2x16xf32>
    %202 = arith.addf %196, %201 : vector<2x16xf32>
    %203 = math.tanh %202 : vector<2x16xf32>
    %204 = vector.extract_strided_slice %195 {offsets = [0, 16], sizes = [2, 16], strides = [1, 1]} : vector<2x32xf32> to vector<2x16xf32>
    %cst_44 = arith.constant 1.000000e+00 : f32
    %205 = vector.broadcast %cst_44 : f32 to vector<2x16xf32>
    %206 = arith.subf %205, %204 : vector<2x16xf32>
    %207 = arith.mulf %206, %203 : vector<2x16xf32>
    %208 = vector.extract_strided_slice %195 {offsets = [0, 16], sizes = [2, 16], strides = [1, 1]} : vector<2x32xf32> to vector<2x16xf32>
    %209 = arith.mulf %208, %158 : vector<2x16xf32>
    %210 = arith.addf %207, %209 : vector<2x16xf32>
    %c4 = arith.constant 4 : index
    %c0_45 = arith.constant 0 : index
    %211 = vector.load %arg5[%c4, %c0_45] : memref<16x32xf32, #tpu.memory_space<vmem>>, vector<2x16xf32>
    tpu.vector_store %arg5[%c4, %c0_45], %187 {strides = array<i32>} : memref<16x32xf32, #tpu.memory_space<vmem>>, vector<2x16xf32>,
    %c10 = arith.constant 10 : index
    %c16_46 = arith.constant 16 : index
    %212 = vector.load %arg5[%c10, %c16_46] : memref<16x32xf32, #tpu.memory_space<vmem>>, vector<2x16xf32>
    tpu.vector_store %arg5[%c10, %c16_46], %210 {strides = array<i32>} : memref<16x32xf32, #tpu.memory_space<vmem>>, vector<2x16xf32>,
    %213 = tpu.concatenate %187, %210 in 1 : vector<2x16xf32>, vector<2x16xf32> -> vector<2x32xf32>
    %cst_47 = arith.constant dense<0.000000e+00> : vector<2x96xf32>
    %214 = tpu.matmul %213, %51, %cst_47 {dimension_numbers = #tpu.dot_dimension_numbers<[1], [0], [0], [1], [0, 0, 1, 1], [], []>} : vector<2x32xf32>, vector<32x96xf32>, vector<2x96xf32> -> vector<2x96xf32>
    %215 = vector.extract_strided_slice %50 {offsets = [6, 0], sizes = [2, 96], strides = [1, 1]} : vector<16x96xf32> to vector<2x96xf32>
    %216 = vector.extract_strided_slice %50 {offsets = [8, 0], sizes = [2, 96], strides = [1, 1]} : vector<16x96xf32> to vector<2x96xf32>
    %217 = vector.extract_strided_slice %215 {offsets = [0, 0], sizes = [2, 32], strides = [1, 1]} : vector<2x96xf32> to vector<2x32xf32>
    %218 = vector.extract_strided_slice %214 {offsets = [0, 0], sizes = [2, 32], strides = [1, 1]} : vector<2x96xf32> to vector<2x32xf32>
    %219 = arith.addf %217, %218 : vector<2x32xf32>
    %220 = arith.negf %219 : vector<2x32xf32>
    %221 = math.exp %220 : vector<2x32xf32>
    %cst_48 = arith.constant 1.000000e+00 : f32
    %222 = vector.broadcast %cst_48 : f32 to vector<2x32xf32>
    %223 = arith.addf %222, %221 : vector<2x32xf32>
    %224 = arith.divf %222, %223 : vector<2x32xf32>
    %225 = vector.extract_strided_slice %215 {offsets = [0, 32], sizes = [2, 16], strides = [1, 1]} : vector<2x96xf32> to vector<2x16xf32>
    %226 = vector.extract_strided_slice %224 {offsets = [0, 0], sizes = [2, 16], strides = [1, 1]} : vector<2x32xf32> to vector<2x16xf32>
    %227 = vector.extract_strided_slice %214 {offsets = [0, 32], sizes = [2, 16], strides = [1, 1]} : vector<2x96xf32> to vector<2x16xf32>
    %228 = vector.broadcast %53 : vector<1x16xf32> to vector<2x16xf32>
    %229 = arith.addf %227, %228 : vector<2x16xf32>
    %230 = arith.mulf %226, %229 : vector<2x16xf32>
    %231 = arith.addf %225, %230 : vector<2x16xf32>
    %232 = math.tanh %231 : vector<2x16xf32>
    %233 = vector.extract_strided_slice %224 {offsets = [0, 16], sizes = [2, 16], strides = [1, 1]} : vector<2x32xf32> to vector<2x16xf32>
    %cst_49 = arith.constant 1.000000e+00 : f32
    %234 = vector.broadcast %cst_49 : f32 to vector<2x16xf32>
    %235 = arith.subf %234, %233 : vector<2x16xf32>
    %236 = arith.mulf %235, %232 : vector<2x16xf32>
    %237 = vector.extract_strided_slice %224 {offsets = [0, 16], sizes = [2, 16], strides = [1, 1]} : vector<2x32xf32> to vector<2x16xf32>
    %238 = arith.mulf %237, %187 : vector<2x16xf32>
    %239 = arith.addf %236, %238 : vector<2x16xf32>
    %240 = vector.extract_strided_slice %216 {offsets = [0, 48], sizes = [2, 32], strides = [1, 1]} : vector<2x96xf32> to vector<2x32xf32>
    %241 = vector.extract_strided_slice %214 {offsets = [0, 48], sizes = [2, 32], strides = [1, 1]} : vector<2x96xf32> to vector<2x32xf32>
    %242 = arith.addf %240, %241 : vector<2x32xf32>
    %243 = arith.negf %242 : vector<2x32xf32>
    %244 = math.exp %243 : vector<2x32xf32>
    %cst_50 = arith.constant 1.000000e+00 : f32
    %245 = vector.broadcast %cst_50 : f32 to vector<2x32xf32>
    %246 = arith.addf %245, %244 : vector<2x32xf32>
    %247 = arith.divf %245, %246 : vector<2x32xf32>
    %248 = vector.extract_strided_slice %216 {offsets = [0, 80], sizes = [2, 16], strides = [1, 1]} : vector<2x96xf32> to vector<2x16xf32>
    %249 = vector.extract_strided_slice %247 {offsets = [0, 0], sizes = [2, 16], strides = [1, 1]} : vector<2x32xf32> to vector<2x16xf32>
    %250 = vector.extract_strided_slice %214 {offsets = [0, 80], sizes = [2, 16], strides = [1, 1]} : vector<2x96xf32> to vector<2x16xf32>
    %251 = vector.broadcast %54 : vector<1x16xf32> to vector<2x16xf32>
    %252 = arith.addf %250, %251 : vector<2x16xf32>
    %253 = arith.mulf %249, %252 : vector<2x16xf32>
    %254 = arith.addf %248, %253 : vector<2x16xf32>
    %255 = math.tanh %254 : vector<2x16xf32>
    %256 = vector.extract_strided_slice %247 {offsets = [0, 16], sizes = [2, 16], strides = [1, 1]} : vector<2x32xf32> to vector<2x16xf32>
    %cst_51 = arith.constant 1.000000e+00 : f32
    %257 = vector.broadcast %cst_51 : f32 to vector<2x16xf32>
    %258 = arith.subf %257, %256 : vector<2x16xf32>
    %259 = arith.mulf %258, %255 : vector<2x16xf32>
    %260 = vector.extract_strided_slice %247 {offsets = [0, 16], sizes = [2, 16], strides = [1, 1]} : vector<2x32xf32> to vector<2x16xf32>
    %261 = arith.mulf %260, %210 : vector<2x16xf32>
    %262 = arith.addf %259, %261 : vector<2x16xf32>
    %c6 = arith.constant 6 : index
    %c0_52 = arith.constant 0 : index
    %263 = vector.load %arg5[%c6, %c0_52] : memref<16x32xf32, #tpu.memory_space<vmem>>, vector<2x16xf32>
    tpu.vector_store %arg5[%c6, %c0_52], %239 {strides = array<i32>} : memref<16x32xf32, #tpu.memory_space<vmem>>, vector<2x16xf32>,
    %c8 = arith.constant 8 : index
    %c16_53 = arith.constant 16 : index
    %264 = vector.load %arg5[%c8, %c16_53] : memref<16x32xf32, #tpu.memory_space<vmem>>, vector<2x16xf32>
    tpu.vector_store %arg5[%c8, %c16_53], %262 {strides = array<i32>} : memref<16x32xf32, #tpu.memory_space<vmem>>, vector<2x16xf32>,
    %265 = tpu.concatenate %239, %262 in 1 : vector<2x16xf32>, vector<2x16xf32> -> vector<2x32xf32>
    %cst_54 = arith.constant dense<0.000000e+00> : vector<2x96xf32>
    %266 = tpu.matmul %265, %51, %cst_54 {dimension_numbers = #tpu.dot_dimension_numbers<[1], [0], [0], [1], [0, 0, 1, 1], [], []>} : vector<2x32xf32>, vector<32x96xf32>, vector<2x96xf32> -> vector<2x96xf32>
    %267 = vector.extract_strided_slice %50 {offsets = [8, 0], sizes = [2, 96], strides = [1, 1]} : vector<16x96xf32> to vector<2x96xf32>
    %268 = vector.extract_strided_slice %50 {offsets = [6, 0], sizes = [2, 96], strides = [1, 1]} : vector<16x96xf32> to vector<2x96xf32>
    %269 = vector.extract_strided_slice %267 {offsets = [0, 0], sizes = [2, 32], strides = [1, 1]} : vector<2x96xf32> to vector<2x32xf32>
    %270 = vector.extract_strided_slice %266 {offsets = [0, 0], sizes = [2, 32], strides = [1, 1]} : vector<2x96xf32> to vector<2x32xf32>
    %271 = arith.addf %269, %270 : vector<2x32xf32>
    %272 = arith.negf %271 : vector<2x32xf32>
    %273 = math.exp %272 : vector<2x32xf32>
    %cst_55 = arith.constant 1.000000e+00 : f32
    %274 = vector.broadcast %cst_55 : f32 to vector<2x32xf32>
    %275 = arith.addf %274, %273 : vector<2x32xf32>
    %276 = arith.divf %274, %275 : vector<2x32xf32>
    %277 = vector.extract_strided_slice %267 {offsets = [0, 32], sizes = [2, 16], strides = [1, 1]} : vector<2x96xf32> to vector<2x16xf32>
    %278 = vector.extract_strided_slice %276 {offsets = [0, 0], sizes = [2, 16], strides = [1, 1]} : vector<2x32xf32> to vector<2x16xf32>
    %279 = vector.extract_strided_slice %266 {offsets = [0, 32], sizes = [2, 16], strides = [1, 1]} : vector<2x96xf32> to vector<2x16xf32>
    %280 = vector.broadcast %53 : vector<1x16xf32> to vector<2x16xf32>
    %281 = arith.addf %279, %280 : vector<2x16xf32>
    %282 = arith.mulf %278, %281 : vector<2x16xf32>
    %283 = arith.addf %277, %282 : vector<2x16xf32>
    %284 = math.tanh %283 : vector<2x16xf32>
    %285 = vector.extract_strided_slice %276 {offsets = [0, 16], sizes = [2, 16], strides = [1, 1]} : vector<2x32xf32> to vector<2x16xf32>
    %cst_56 = arith.constant 1.000000e+00 : f32
    %286 = vector.broadcast %cst_56 : f32 to vector<2x16xf32>
    %287 = arith.subf %286, %285 : vector<2x16xf32>
    %288 = arith.mulf %287, %284 : vector<2x16xf32>
    %289 = vector.extract_strided_slice %276 {offsets = [0, 16], sizes = [2, 16], strides = [1, 1]} : vector<2x32xf32> to vector<2x16xf32>
    %290 = arith.mulf %289, %239 : vector<2x16xf32>
    %291 = arith.addf %288, %290 : vector<2x16xf32>
    %292 = vector.extract_strided_slice %268 {offsets = [0, 48], sizes = [2, 32], strides = [1, 1]} : vector<2x96xf32> to vector<2x32xf32>
    %293 = vector.extract_strided_slice %266 {offsets = [0, 48], sizes = [2, 32], strides = [1, 1]} : vector<2x96xf32> to vector<2x32xf32>
    %294 = arith.addf %292, %293 : vector<2x32xf32>
    %295 = arith.negf %294 : vector<2x32xf32>
    %296 = math.exp %295 : vector<2x32xf32>
    %cst_57 = arith.constant 1.000000e+00 : f32
    %297 = vector.broadcast %cst_57 : f32 to vector<2x32xf32>
    %298 = arith.addf %297, %296 : vector<2x32xf32>
    %299 = arith.divf %297, %298 : vector<2x32xf32>
    %300 = vector.extract_strided_slice %268 {offsets = [0, 80], sizes = [2, 16], strides = [1, 1]} : vector<2x96xf32> to vector<2x16xf32>
    %301 = vector.extract_strided_slice %299 {offsets = [0, 0], sizes = [2, 16], strides = [1, 1]} : vector<2x32xf32> to vector<2x16xf32>
    %302 = vector.extract_strided_slice %266 {offsets = [0, 80], sizes = [2, 16], strides = [1, 1]} : vector<2x96xf32> to vector<2x16xf32>
    %303 = vector.broadcast %54 : vector<1x16xf32> to vector<2x16xf32>
    %304 = arith.addf %302, %303 : vector<2x16xf32>
    %305 = arith.mulf %301, %304 : vector<2x16xf32>
    %306 = arith.addf %300, %305 : vector<2x16xf32>
    %307 = math.tanh %306 : vector<2x16xf32>
    %308 = vector.extract_strided_slice %299 {offsets = [0, 16], sizes = [2, 16], strides = [1, 1]} : vector<2x32xf32> to vector<2x16xf32>
    %cst_58 = arith.constant 1.000000e+00 : f32
    %309 = vector.broadcast %cst_58 : f32 to vector<2x16xf32>
    %310 = arith.subf %309, %308 : vector<2x16xf32>
    %311 = arith.mulf %310, %307 : vector<2x16xf32>
    %312 = vector.extract_strided_slice %299 {offsets = [0, 16], sizes = [2, 16], strides = [1, 1]} : vector<2x32xf32> to vector<2x16xf32>
    %313 = arith.mulf %312, %262 : vector<2x16xf32>
    %314 = arith.addf %311, %313 : vector<2x16xf32>
    %c8_59 = arith.constant 8 : index
    %c0_60 = arith.constant 0 : index
    %315 = vector.load %arg5[%c8_59, %c0_60] : memref<16x32xf32, #tpu.memory_space<vmem>>, vector<2x16xf32>
    tpu.vector_store %arg5[%c8_59, %c0_60], %291 {strides = array<i32>} : memref<16x32xf32, #tpu.memory_space<vmem>>, vector<2x16xf32>,
    %c6_61 = arith.constant 6 : index
    %c16_62 = arith.constant 16 : index
    %316 = vector.load %arg5[%c6_61, %c16_62] : memref<16x32xf32, #tpu.memory_space<vmem>>, vector<2x16xf32>
    tpu.vector_store %arg5[%c6_61, %c16_62], %314 {strides = array<i32>} : memref<16x32xf32, #tpu.memory_space<vmem>>, vector<2x16xf32>,
    %317 = tpu.concatenate %291, %314 in 1 : vector<2x16xf32>, vector<2x16xf32> -> vector<2x32xf32>
    %cst_63 = arith.constant dense<0.000000e+00> : vector<2x96xf32>
    %318 = tpu.matmul %317, %51, %cst_63 {dimension_numbers = #tpu.dot_dimension_numbers<[1], [0], [0], [1], [0, 0, 1, 1], [], []>} : vector<2x32xf32>, vector<32x96xf32>, vector<2x96xf32> -> vector<2x96xf32>
    %319 = vector.extract_strided_slice %50 {offsets = [10, 0], sizes = [2, 96], strides = [1, 1]} : vector<16x96xf32> to vector<2x96xf32>
    %320 = vector.extract_strided_slice %50 {offsets = [4, 0], sizes = [2, 96], strides = [1, 1]} : vector<16x96xf32> to vector<2x96xf32>
    %321 = vector.extract_strided_slice %319 {offsets = [0, 0], sizes = [2, 32], strides = [1, 1]} : vector<2x96xf32> to vector<2x32xf32>
    %322 = vector.extract_strided_slice %318 {offsets = [0, 0], sizes = [2, 32], strides = [1, 1]} : vector<2x96xf32> to vector<2x32xf32>
    %323 = arith.addf %321, %322 : vector<2x32xf32>
    %324 = arith.negf %323 : vector<2x32xf32>
    %325 = math.exp %324 : vector<2x32xf32>
    %cst_64 = arith.constant 1.000000e+00 : f32
    %326 = vector.broadcast %cst_64 : f32 to vector<2x32xf32>
    %327 = arith.addf %326, %325 : vector<2x32xf32>
    %328 = arith.divf %326, %327 : vector<2x32xf32>
    %329 = vector.extract_strided_slice %319 {offsets = [0, 32], sizes = [2, 16], strides = [1, 1]} : vector<2x96xf32> to vector<2x16xf32>
    %330 = vector.extract_strided_slice %328 {offsets = [0, 0], sizes = [2, 16], strides = [1, 1]} : vector<2x32xf32> to vector<2x16xf32>
    %331 = vector.extract_strided_slice %318 {offsets = [0, 32], sizes = [2, 16], strides = [1, 1]} : vector<2x96xf32> to vector<2x16xf32>
    %332 = vector.broadcast %53 : vector<1x16xf32> to vector<2x16xf32>
    %333 = arith.addf %331, %332 : vector<2x16xf32>
    %334 = arith.mulf %330, %333 : vector<2x16xf32>
    %335 = arith.addf %329, %334 : vector<2x16xf32>
    %336 = math.tanh %335 : vector<2x16xf32>
    %337 = vector.extract_strided_slice %328 {offsets = [0, 16], sizes = [2, 16], strides = [1, 1]} : vector<2x32xf32> to vector<2x16xf32>
    %cst_65 = arith.constant 1.000000e+00 : f32
    %338 = vector.broadcast %cst_65 : f32 to vector<2x16xf32>
    %339 = arith.subf %338, %337 : vector<2x16xf32>
    %340 = arith.mulf %339, %336 : vector<2x16xf32>
    %341 = vector.extract_strided_slice %328 {offsets = [0, 16], sizes = [2, 16], strides = [1, 1]} : vector<2x32xf32> to vector<2x16xf32>
    %342 = arith.mulf %341, %291 : vector<2x16xf32>
    %343 = arith.addf %340, %342 : vector<2x16xf32>
    %344 = vector.extract_strided_slice %320 {offsets = [0, 48], sizes = [2, 32], strides = [1, 1]} : vector<2x96xf32> to vector<2x32xf32>
    %345 = vector.extract_strided_slice %318 {offsets = [0, 48], sizes = [2, 32], strides = [1, 1]} : vector<2x96xf32> to vector<2x32xf32>
    %346 = arith.addf %344, %345 : vector<2x32xf32>
    %347 = arith.negf %346 : vector<2x32xf32>
    %348 = math.exp %347 : vector<2x32xf32>
    %cst_66 = arith.constant 1.000000e+00 : f32
    %349 = vector.broadcast %cst_66 : f32 to vector<2x32xf32>
    %350 = arith.addf %349, %348 : vector<2x32xf32>
    %351 = arith.divf %349, %350 : vector<2x32xf32>
    %352 = vector.extract_strided_slice %320 {offsets = [0, 80], sizes = [2, 16], strides = [1, 1]} : vector<2x96xf32> to vector<2x16xf32>
    %353 = vector.extract_strided_slice %351 {offsets = [0, 0], sizes = [2, 16], strides = [1, 1]} : vector<2x32xf32> to vector<2x16xf32>
    %354 = vector.extract_strided_slice %318 {offsets = [0, 80], sizes = [2, 16], strides = [1, 1]} : vector<2x96xf32> to vector<2x16xf32>
    %355 = vector.broadcast %54 : vector<1x16xf32> to vector<2x16xf32>
    %356 = arith.addf %354, %355 : vector<2x16xf32>
    %357 = arith.mulf %353, %356 : vector<2x16xf32>
    %358 = arith.addf %352, %357 : vector<2x16xf32>
    %359 = math.tanh %358 : vector<2x16xf32>
    %360 = vector.extract_strided_slice %351 {offsets = [0, 16], sizes = [2, 16], strides = [1, 1]} : vector<2x32xf32> to vector<2x16xf32>
    %cst_67 = arith.constant 1.000000e+00 : f32
    %361 = vector.broadcast %cst_67 : f32 to vector<2x16xf32>
    %362 = arith.subf %361, %360 : vector<2x16xf32>
    %363 = arith.mulf %362, %359 : vector<2x16xf32>
    %364 = vector.extract_strided_slice %351 {offsets = [0, 16], sizes = [2, 16], strides = [1, 1]} : vector<2x32xf32> to vector<2x16xf32>
    %365 = arith.mulf %364, %314 : vector<2x16xf32>
    %366 = arith.addf %363, %365 : vector<2x16xf32>
    %c10_68 = arith.constant 10 : index
    %c0_69 = arith.constant 0 : index
    %367 = vector.load %arg5[%c10_68, %c0_69] : memref<16x32xf32, #tpu.memory_space<vmem>>, vector<2x16xf32>
    tpu.vector_store %arg5[%c10_68, %c0_69], %343 {strides = array<i32>} : memref<16x32xf32, #tpu.memory_space<vmem>>, vector<2x16xf32>,
    %c4_70 = arith.constant 4 : index
    %c16_71 = arith.constant 16 : index
    %368 = vector.load %arg5[%c4_70, %c16_71] : memref<16x32xf32, #tpu.memory_space<vmem>>, vector<2x16xf32>
    tpu.vector_store %arg5[%c4_70, %c16_71], %366 {strides = array<i32>} : memref<16x32xf32, #tpu.memory_space<vmem>>, vector<2x16xf32>,
    %369 = tpu.concatenate %343, %366 in 1 : vector<2x16xf32>, vector<2x16xf32> -> vector<2x32xf32>
    %cst_72 = arith.constant dense<0.000000e+00> : vector<2x96xf32>
    %370 = tpu.matmul %369, %51, %cst_72 {dimension_numbers = #tpu.dot_dimension_numbers<[1], [0], [0], [1], [0, 0, 1, 1], [], []>} : vector<2x32xf32>, vector<32x96xf32>, vector<2x96xf32> -> vector<2x96xf32>
    %371 = vector.extract_strided_slice %50 {offsets = [12, 0], sizes = [2, 96], strides = [1, 1]} : vector<16x96xf32> to vector<2x96xf32>
    %372 = vector.extract_strided_slice %50 {offsets = [2, 0], sizes = [2, 96], strides = [1, 1]} : vector<16x96xf32> to vector<2x96xf32>
    %373 = vector.extract_strided_slice %371 {offsets = [0, 0], sizes = [2, 32], strides = [1, 1]} : vector<2x96xf32> to vector<2x32xf32>
    %374 = vector.extract_strided_slice %370 {offsets = [0, 0], sizes = [2, 32], strides = [1, 1]} : vector<2x96xf32> to vector<2x32xf32>
    %375 = arith.addf %373, %374 : vector<2x32xf32>
    %376 = arith.negf %375 : vector<2x32xf32>
    %377 = math.exp %376 : vector<2x32xf32>
    %cst_73 = arith.constant 1.000000e+00 : f32
    %378 = vector.broadcast %cst_73 : f32 to vector<2x32xf32>
    %379 = arith.addf %378, %377 : vector<2x32xf32>
    %380 = arith.divf %378, %379 : vector<2x32xf32>
    %381 = vector.extract_strided_slice %371 {offsets = [0, 32], sizes = [2, 16], strides = [1, 1]} : vector<2x96xf32> to vector<2x16xf32>
    %382 = vector.extract_strided_slice %380 {offsets = [0, 0], sizes = [2, 16], strides = [1, 1]} : vector<2x32xf32> to vector<2x16xf32>
    %383 = vector.extract_strided_slice %370 {offsets = [0, 32], sizes = [2, 16], strides = [1, 1]} : vector<2x96xf32> to vector<2x16xf32>
    %384 = vector.broadcast %53 : vector<1x16xf32> to vector<2x16xf32>
    %385 = arith.addf %383, %384 : vector<2x16xf32>
    %386 = arith.mulf %382, %385 : vector<2x16xf32>
    %387 = arith.addf %381, %386 : vector<2x16xf32>
    %388 = math.tanh %387 : vector<2x16xf32>
    %389 = vector.extract_strided_slice %380 {offsets = [0, 16], sizes = [2, 16], strides = [1, 1]} : vector<2x32xf32> to vector<2x16xf32>
    %cst_74 = arith.constant 1.000000e+00 : f32
    %390 = vector.broadcast %cst_74 : f32 to vector<2x16xf32>
    %391 = arith.subf %390, %389 : vector<2x16xf32>
    %392 = arith.mulf %391, %388 : vector<2x16xf32>
    %393 = vector.extract_strided_slice %380 {offsets = [0, 16], sizes = [2, 16], strides = [1, 1]} : vector<2x32xf32> to vector<2x16xf32>
    %394 = arith.mulf %393, %343 : vector<2x16xf32>
    %395 = arith.addf %392, %394 : vector<2x16xf32>
    %396 = vector.extract_strided_slice %372 {offsets = [0, 48], sizes = [2, 32], strides = [1, 1]} : vector<2x96xf32> to vector<2x32xf32>
    %397 = vector.extract_strided_slice %370 {offsets = [0, 48], sizes = [2, 32], strides = [1, 1]} : vector<2x96xf32> to vector<2x32xf32>
    %398 = arith.addf %396, %397 : vector<2x32xf32>
    %399 = arith.negf %398 : vector<2x32xf32>
    %400 = math.exp %399 : vector<2x32xf32>
    %cst_75 = arith.constant 1.000000e+00 : f32
    %401 = vector.broadcast %cst_75 : f32 to vector<2x32xf32>
    %402 = arith.addf %401, %400 : vector<2x32xf32>
    %403 = arith.divf %401, %402 : vector<2x32xf32>
    %404 = vector.extract_strided_slice %372 {offsets = [0, 80], sizes = [2, 16], strides = [1, 1]} : vector<2x96xf32> to vector<2x16xf32>
    %405 = vector.extract_strided_slice %403 {offsets = [0, 0], sizes = [2, 16], strides = [1, 1]} : vector<2x32xf32> to vector<2x16xf32>
    %406 = vector.extract_strided_slice %370 {offsets = [0, 80], sizes = [2, 16], strides = [1, 1]} : vector<2x96xf32> to vector<2x16xf32>
    %407 = vector.broadcast %54 : vector<1x16xf32> to vector<2x16xf32>
    %408 = arith.addf %406, %407 : vector<2x16xf32>
    %409 = arith.mulf %405, %408 : vector<2x16xf32>
    %410 = arith.addf %404, %409 : vector<2x16xf32>
    %411 = math.tanh %410 : vector<2x16xf32>
    %412 = vector.extract_strided_slice %403 {offsets = [0, 16], sizes = [2, 16], strides = [1, 1]} : vector<2x32xf32> to vector<2x16xf32>
    %cst_76 = arith.constant 1.000000e+00 : f32
    %413 = vector.broadcast %cst_76 : f32 to vector<2x16xf32>
    %414 = arith.subf %413, %412 : vector<2x16xf32>
    %415 = arith.mulf %414, %411 : vector<2x16xf32>
    %416 = vector.extract_strided_slice %403 {offsets = [0, 16], sizes = [2, 16], strides = [1, 1]} : vector<2x32xf32> to vector<2x16xf32>
    %417 = arith.mulf %416, %366 : vector<2x16xf32>
    %418 = arith.addf %415, %417 : vector<2x16xf32>
    %c12_77 = arith.constant 12 : index
    %c0_78 = arith.constant 0 : index
    %419 = vector.load %arg5[%c12_77, %c0_78] : memref<16x32xf32, #tpu.memory_space<vmem>>, vector<2x16xf32>
    tpu.vector_store %arg5[%c12_77, %c0_78], %395 {strides = array<i32>} : memref<16x32xf32, #tpu.memory_space<vmem>>, vector<2x16xf32>,
    %c2_79 = arith.constant 2 : index
    %c16_80 = arith.constant 16 : index
    %420 = vector.load %arg5[%c2_79, %c16_80] : memref<16x32xf32, #tpu.memory_space<vmem>>, vector<2x16xf32>
    tpu.vector_store %arg5[%c2_79, %c16_80], %418 {strides = array<i32>} : memref<16x32xf32, #tpu.memory_space<vmem>>, vector<2x16xf32>,
    %421 = tpu.concatenate %395, %418 in 1 : vector<2x16xf32>, vector<2x16xf32> -> vector<2x32xf32>
    %cst_81 = arith.constant dense<0.000000e+00> : vector<2x96xf32>
    %422 = tpu.matmul %421, %51, %cst_81 {dimension_numbers = #tpu.dot_dimension_numbers<[1], [0], [0], [1], [0, 0, 1, 1], [], []>} : vector<2x32xf32>, vector<32x96xf32>, vector<2x96xf32> -> vector<2x96xf32>
    %423 = vector.extract_strided_slice %50 {offsets = [14, 0], sizes = [2, 96], strides = [1, 1]} : vector<16x96xf32> to vector<2x96xf32>
    %424 = vector.extract_strided_slice %50 {offsets = [0, 0], sizes = [2, 96], strides = [1, 1]} : vector<16x96xf32> to vector<2x96xf32>
    %425 = vector.extract_strided_slice %423 {offsets = [0, 0], sizes = [2, 32], strides = [1, 1]} : vector<2x96xf32> to vector<2x32xf32>
    %426 = vector.extract_strided_slice %422 {offsets = [0, 0], sizes = [2, 32], strides = [1, 1]} : vector<2x96xf32> to vector<2x32xf32>
    %427 = arith.addf %425, %426 : vector<2x32xf32>
    %428 = arith.negf %427 : vector<2x32xf32>
    %429 = math.exp %428 : vector<2x32xf32>
    %cst_82 = arith.constant 1.000000e+00 : f32
    %430 = vector.broadcast %cst_82 : f32 to vector<2x32xf32>
    %431 = arith.addf %430, %429 : vector<2x32xf32>
    %432 = arith.divf %430, %431 : vector<2x32xf32>
    %433 = vector.extract_strided_slice %423 {offsets = [0, 32], sizes = [2, 16], strides = [1, 1]} : vector<2x96xf32> to vector<2x16xf32>
    %434 = vector.extract_strided_slice %432 {offsets = [0, 0], sizes = [2, 16], strides = [1, 1]} : vector<2x32xf32> to vector<2x16xf32>
    %435 = vector.extract_strided_slice %422 {offsets = [0, 32], sizes = [2, 16], strides = [1, 1]} : vector<2x96xf32> to vector<2x16xf32>
    %436 = vector.broadcast %53 : vector<1x16xf32> to vector<2x16xf32>
    %437 = arith.addf %435, %436 : vector<2x16xf32>
    %438 = arith.mulf %434, %437 : vector<2x16xf32>
    %439 = arith.addf %433, %438 : vector<2x16xf32>
    %440 = math.tanh %439 : vector<2x16xf32>
    %441 = vector.extract_strided_slice %432 {offsets = [0, 16], sizes = [2, 16], strides = [1, 1]} : vector<2x32xf32> to vector<2x16xf32>
    %cst_83 = arith.constant 1.000000e+00 : f32
    %442 = vector.broadcast %cst_83 : f32 to vector<2x16xf32>
    %443 = arith.subf %442, %441 : vector<2x16xf32>
    %444 = arith.mulf %443, %440 : vector<2x16xf32>
    %445 = vector.extract_strided_slice %432 {offsets = [0, 16], sizes = [2, 16], strides = [1, 1]} : vector<2x32xf32> to vector<2x16xf32>
    %446 = arith.mulf %445, %395 : vector<2x16xf32>
    %447 = arith.addf %444, %446 : vector<2x16xf32>
    %448 = vector.extract_strided_slice %424 {offsets = [0, 48], sizes = [2, 32], strides = [1, 1]} : vector<2x96xf32> to vector<2x32xf32>
    %449 = vector.extract_strided_slice %422 {offsets = [0, 48], sizes = [2, 32], strides = [1, 1]} : vector<2x96xf32> to vector<2x32xf32>
    %450 = arith.addf %448, %449 : vector<2x32xf32>
    %451 = arith.negf %450 : vector<2x32xf32>
    %452 = math.exp %451 : vector<2x32xf32>
    %cst_84 = arith.constant 1.000000e+00 : f32
    %453 = vector.broadcast %cst_84 : f32 to vector<2x32xf32>
    %454 = arith.addf %453, %452 : vector<2x32xf32>
    %455 = arith.divf %453, %454 : vector<2x32xf32>
    %456 = vector.extract_strided_slice %424 {offsets = [0, 80], sizes = [2, 16], strides = [1, 1]} : vector<2x96xf32> to vector<2x16xf32>
    %457 = vector.extract_strided_slice %455 {offsets = [0, 0], sizes = [2, 16], strides = [1, 1]} : vector<2x32xf32> to vector<2x16xf32>
    %458 = vector.extract_strided_slice %422 {offsets = [0, 80], sizes = [2, 16], strides = [1, 1]} : vector<2x96xf32> to vector<2x16xf32>
    %459 = vector.broadcast %54 : vector<1x16xf32> to vector<2x16xf32>
    %460 = arith.addf %458, %459 : vector<2x16xf32>
    %461 = arith.mulf %457, %460 : vector<2x16xf32>
    %462 = arith.addf %456, %461 : vector<2x16xf32>
    %463 = math.tanh %462 : vector<2x16xf32>
    %464 = vector.extract_strided_slice %455 {offsets = [0, 16], sizes = [2, 16], strides = [1, 1]} : vector<2x32xf32> to vector<2x16xf32>
    %cst_85 = arith.constant 1.000000e+00 : f32
    %465 = vector.broadcast %cst_85 : f32 to vector<2x16xf32>
    %466 = arith.subf %465, %464 : vector<2x16xf32>
    %467 = arith.mulf %466, %463 : vector<2x16xf32>
    %468 = vector.extract_strided_slice %455 {offsets = [0, 16], sizes = [2, 16], strides = [1, 1]} : vector<2x32xf32> to vector<2x16xf32>
    %469 = arith.mulf %468, %418 : vector<2x16xf32>
    %470 = arith.addf %467, %469 : vector<2x16xf32>
    %c14_86 = arith.constant 14 : index
    %c0_87 = arith.constant 0 : index
    %471 = vector.load %arg5[%c14_86, %c0_87] : memref<16x32xf32, #tpu.memory_space<vmem>>, vector<2x16xf32>
    tpu.vector_store %arg5[%c14_86, %c0_87], %447 {strides = array<i32>} : memref<16x32xf32, #tpu.memory_space<vmem>>, vector<2x16xf32>,
    %c0_88 = arith.constant 0 : index
    %c16_89 = arith.constant 16 : index
    %472 = vector.load %arg5[%c0_88, %c16_89] : memref<16x32xf32, #tpu.memory_space<vmem>>, vector<2x16xf32>
    tpu.vector_store %arg5[%c0_88, %c16_89], %470 {strides = array<i32>} : memref<16x32xf32, #tpu.memory_space<vmem>>, vector<2x16xf32>,
    %c256 = arith.constant 256 : index
    %c0_90 = arith.constant 0 : index
    %473 = vector.load %arg3[%c256, %c0_90] : memref<304x128xf32, #tpu.memory_space<vmem>>, vector<16x16xf32>
    %c0_91 = arith.constant 0 : index
    %c0_92 = arith.constant 0 : index
    %474 = vector.load %arg5[%c0_91, %c0_92] : memref<16x32xf32, #tpu.memory_space<vmem>>, vector<16x32xf32>
    %cst_93 = arith.constant dense<0.000000e+00> : vector<16x32xf32>
    %475 = tpu.matmul %473, %474, %cst_93 {dimension_numbers = #tpu.dot_dimension_numbers<[1], [0], [0], [1], [0, 0, 1, 1], [], []>} : vector<16x16xf32>, vector<16x32xf32>, vector<16x32xf32> -> vector<16x32xf32>
    %c80 = arith.constant 80 : index
    %c0_94 = arith.constant 0 : index
    %476 = vector.load %arg3[%c80, %c0_94] : memref<304x128xf32, #tpu.memory_space<vmem>>, vector<32x128xf32>
    %cst_95 = arith.constant dense<0.000000e+00> : vector<16x128xf32>
    %477 = tpu.matmul %475, %476, %cst_95 {dimension_numbers = #tpu.dot_dimension_numbers<[1], [0], [0], [1], [0, 0, 1, 1], [], []>} : vector<16x32xf32>, vector<32x128xf32>, vector<16x128xf32> -> vector<16x128xf32>
    %c288 = arith.constant 288 : index
    %c0_96 = arith.constant 0 : index
    %478 = vector.load %arg3[%c288, %c0_96] : memref<304x128xf32, #tpu.memory_space<vmem>>, vector<1x128xf32>
    %479 = vector.broadcast %478 : vector<1x128xf32> to vector<16x128xf32>
    %480 = arith.addf %477, %479 : vector<16x128xf32>
    %cst_97 = arith.constant 0.000000e+00 : f32
    %481 = vector.broadcast %cst_97 : f32 to vector<16x128xf32>
    %482 = arith.maximumf %480, %481 : vector<16x128xf32>
    %c112 = arith.constant 112 : index
    %c0_98 = arith.constant 0 : index
    %483 = vector.load %arg3[%c112, %c0_98] : memref<304x128xf32, #tpu.memory_space<vmem>>, vector<128x128xf32>
    %cst_99 = arith.constant dense<0.000000e+00> : vector<16x128xf32>
    %484 = tpu.matmul %482, %483, %cst_99 {dimension_numbers = #tpu.dot_dimension_numbers<[1], [0], [0], [1], [0, 0, 1, 1], [], []>} : vector<16x128xf32>, vector<128x128xf32>, vector<16x128xf32> -> vector<16x128xf32>
    %c296 = arith.constant 296 : index
    %c0_100 = arith.constant 0 : index
    %485 = vector.load %arg3[%c296, %c0_100] : memref<304x128xf32, #tpu.memory_space<vmem>>, vector<1x128xf32>
    %486 = vector.broadcast %485 : vector<1x128xf32> to vector<16x128xf32>
    %487 = arith.addf %484, %486 : vector<16x128xf32>
    %c0_101 = arith.constant 0 : index
    %c0_102 = arith.constant 0 : index
    %488 = vector.load %arg4[%c0_101, %c0_102] : memref<16x128xf32, #tpu.memory_space<vmem>>, vector<16x128xf32>
    tpu.vector_store %arg4[%c0_101, %c0_102], %487 {strides = array<i32>} : memref<16x128xf32, #tpu.memory_space<vmem>>, vector<16x128xf32>,
    return
  }
}

</mosaic_0001>

<bundles_post_ra>
// kernel: enc_mtan_rnn_forward.1
= control target key start
LH: loop header
LB: loop body
LE: loop exit
PB: predicated region body
PF: predicated region fallthrough
CT: control target
= control target key end

     0   :  { %vm21_vm0 = vcmask 195584   ;;  %v2723_v2 = vmov 0.0|0.0   ;;  %vm2724_vm1 = vmmov 0   ;;  %v2725_v3 = vmov 0.0   ;;  %s2726_s8 = smov 124   ;;  %s2727_s14 = smov 8   ;;  %s3206_s1 = inlined_call_operand.vmem [shape: f32[24,32], index: 1, kind: input, shape index: {}]   ;;  %s3207_s3 = inlined_call_operand.vmem [shape: f32[304,128], index: 3, kind: input, shape index: {}]   ;;  %s3208_s0 = inlined_call_operand.vmem [shape: f32[8,24], index: 0, kind: input, shape index: {}]   ;;  %s3209_s2 = inlined_call_operand.vmem [shape: f32[2,16,8], index: 2, kind: input, shape index: {}]   ;;  %s3210_s4 = inlined_call_operand.vmem [shape: f32[16,128], index: 4, kind: output, shape index: {}]  }
   0x1   :  { %v97_v0 = vld [vmem:[%s3206_s1] sm:$0xff]  ;;  %v98_v1 = vld [vmem:[%s3206_s1 + $0x8] sm:$0xff]  ;;  %2486 = vmatprep.subr.bf16.mxu0 %v2723_v2  ;;  %2300 = vmatprep.mubr.msk.f32.mxu0 %vm2724_vm1, %v2725_v3  ;;  %v95_v5 = vld [vmem:[%s3207_s3 + $0x18] sm:$0xff]  ;;  %vm181_vm2 = vcmask 130048   ;;  %vm363_vm3 = vcmask 261248   ;;  %vm274_vm4 = vcmask 31744  }
   0x2   :  { %v2489_v4 = vpack.c.bf16 %v98_v1, %v97_v0  ;;  %v18_v6 = vld [vmem:[%s3207_s3] sm:$0xff]  ;;  %v19_v7 = vld [vmem:[%s3207_s3 + $0x8] sm:$0xff]  ;;  %v99_v8 = vld [vmem:[%s3206_s1 + $0x10] sm:$0xff]  ;;  %2309 = vmatprep.mubr.msk.f32.mxu1 %vm21_vm0, %v95_v5  ;;  %vm287_vm5 = vcmask 64512   ;;  %s2729_s15 = smov 120   ;;  %s2730_s30 = smov 32  }
   0x3   :  { %v2487_v9 = vpack.c.bf16 %v19_v7, %v18_v6  ;;  %v20_v10 = vld [vmem:[%s3207_s3 + $0x10] sm:$0xff]  ;;  %v96_v11 = vld [vmem:[%s3207_s3 + $0x20] sm:$0xff]  ;;  %v257_v13 = vld [vmem:[%s3209_s2 + $0x8] sm:$0xff]  ;;  %s2731_s5 = smov 64   ;;  %s2732_s9 = smov 96   ;;  %vm803_vm6 = vcmask 123904  }
   0x4   :  { %2490 = vmatprep.subr.bf16.mxu1 %v2489_v4  ;;  %v17_v12 = vld [vmem:[%s3208_s0] sm:$0xff]  ;;  %270 = vrot.lane.b32.xlu1 %v257_v13, %s2726_s8  ;;  %v258_v14 = vld [vmem:[%s3209_s2 + $0x10] sm:$0xff]  ;;  %v259_v15 = vld [vmem:[%s3209_s2 + $0x18] sm:$0xff]  ;;  %s2733_s10 = smov 80   ;;  %vm656_vm7 = vcmask 261120   ;;  %vm958_vm8 = vcmask 125954  }
   0x5   :  { %2492 = vmatpush3.bf16.msra.mxu1 %v2489_v4  ;;  %2488 = vmatpush3.bf16.msra.mxu0 %v2487_v9  ;;  %v256_v26 = vld [vmem:[%s3209_s2] sm:$0xff]  ;;  %s2728_s2 = smov 112   ;;  %v481_v6 = vld [vmem:[%s3207_s3 + $0x28] sm:$0xff]  ;;  %vm1113_vm9 = vcmask 128004   ;;  %vm1266_vm10 = vcmask 130054   ;;  %vm964_vm11 = vcmask 259204  }
   0x6   :  { %2307 = vmatprep.subr.mxu1 %v99_v8  ;;  %2298 = vmatprep.subr.mxu0 %v2725_v3  ;;  %vm809_vm12 = vcmask 261254   ;;  %vm1272_vm13 = vcmask 255104   ;;  %vm1119_vm14 = vcmask 257154  }
   0x8   :  { %372 = vrot.lane.b32.xlu1 %v258_v14, %s2726_s8 }
   0x9   :  { %2308 = vmatpush3.msra.mxu1 %v99_v8  ;;  %2299 = vmatpush3.msra.mxu0 %v20_v10 }
   0xa   :  { %2310 = vmatmul.mubr.msk.f32.vlgmr.msra.gmra.mrb[0].mxu1 %vm21_vm0, %v96_v11  ;;  %2301 = vmatmul.mubr.msk.f32.vlgmr.msra.gmra.mrb[0].mxu0 %vm21_vm0, %v17_v12 }
   0xb   :  { %2493 = vmatprep.subr.bf16.mxu0 %v2723_v2  ;;  %2316 = vmatprep.mubr.msk.f32.mxu0 %vm2724_vm1, %v2725_v3 }
   0xc   :  { %374 = vrot.lane.b32.xlu1 %v259_v15, %s2726_s8  ;;  %2333 = vmatprep.subr.mxu1 %v481_v6 }
   0xd   :  { %2334 = vmatpush3.msra.mxu1 %v481_v6 }
   0xe   :  { %2518 = vmatprep.subr.bf16.mxu1 %v2723_v2 }
  0x76   :  { %v271_v27 = vpop.permute.xlu1 %270 }
  0x77   :  { %v276_v33 = vsel %vm274_vm4, %v271_v27, %v257_v13  ;;  %v569_v27 = vld [vmem:[%s3207_s3 + $0xf8] sm:$0xff] }
  0x78   :  { %v278_v45 = vmul.f32 %v276_v33, %v257_v13  ;;  %v568_v13 = vld [vmem:[%s3207_s3 + $0xf0] sm:$0xff] }
  0x7a   :  { %v373_v28 = vpop.permute.xlu1 %372 }
  0x7b   :  { %v378_v37 = vsel %vm274_vm4, %v373_v28, %v258_v14 }
  0x7c   :  { %v380_v53 = vmul.f32 %v378_v37, %v258_v14  ;;  %v651_v14 = vld [vmem:[%s3207_s3 + $0x30] sm:$0xff] }
  0x7e   :  { %v375_v35 = vpop.permute.xlu1 %374 }
  0x7f   :  { %v379_v38 = vsel %vm274_vm4, %v375_v35, %v259_v15 }
  0x80   :  { %v2614_v39 = vpack.i.bf16 %v379_v38, %v378_v37  ;;  %v381_v54 = vmul.f32 %v379_v38, %v259_v15  ;;  %v652_v15 = vld [vmem:[%s3207_s3 + $0x38] sm:$0xff] }
  0xdd   :  { %v2311_v16 = vpop.f32.mrb[0].mxu1  ;;  %v91_v17 = vpop.f32.mrb[0].mxu0 }
  0xde   :  { %v172_v18 = vpop.f32.mrb[1].mxu1  ;;  %v2302_v19 = vpop.f32.mrb[1].mxu0 }
  0xdf   :  { %v2494_v20 = vpack.c.bf16 %v2311_v16, %v172_v18  ;;  %v2841_v16 = vpack.c.bf16 %v652_v15, %v651_v14  ;;  %v654_v18 = vld [vmem:[%s3207_s3 + $0x48] sm:$0xff] }
  0xe1   :  { %2495 = vmatpush3.bf16.msra.mxu0 %v2494_v20  ;;  %v2172_v20 = vld [vmem:[%s3207_s3 + $0x118] ss:$0 sm:$0xff] }
  0xe2   :  { %2496 = vmatprep.subr.bf16.mxu0 %v2723_v2 }
  0xe4   :  { %2317 = vmatmul.mubr.msk.f32.vlgmr.msra.gmra.mrb[2].mxu0 %vm181_vm2, %v91_v17  ;;  %v653_v17 = vld [vmem:[%s3207_s3 + $0x40] sm:$0xff] }
  0xe5   :  { %2323 = vmatprep.mubr.msk.f32.mxu0 %vm2724_vm1, %v2725_v3  ;;  %v2851_v19 = vpack.c.bf16 %v654_v18, %v653_v17 }
 0x1b7   :  { %v251_v21 = vpop.f32.mrb[2].mxu0 }
 0x1b8   :  { %v255_v22 = vmul.f32 0.25, %v251_v21  ;;  %v2318_v23 = vpop.f32.mrb[3].mxu0  ;;  %v2166_v21 = vld [vmem:[%s3207_s3 + $0x110] ss:$0 sm:$0xff] }
 0x1ba   :  { %v364_v24 = vsel %vm363_vm3, %v255_v22, -inf  ;;  %v260_v25 = vsel %vm181_vm2, %v255_v22, -inf }
 0x1bb   :  { %365 = vmax.xlane.f32.xlu0 %v364_v24  ;;  %261 = vmax.xlane.f32.xlu1 %v260_v25 }
 0x1cc   :  { %742 = vrot.lane.b32.xlu1 %v2172_v20, %s2730_s30 }
 0x1d1   :  { %268 = vrot.lane.b32.xlu0 %v256_v26, %s2726_s8 }
 0x248   :  { %v366_v29 = vpop.xlane.xlu0 %365  ;;  %v262_v41 = vpop.xlane.xlu1 %261 }
 0x249   :  { %v367_v30 = vsub.f32 %v255_v22, %v366_v29  ;;  %v263_v42 = vsub.f32 %v255_v22, %v262_v41 }
 0x24b   :  { %v368_v31 = vmul.f32 1.442695, %v367_v30  ;;  %v264_v43 = vmul.f32 1.442695, %v263_v42 }
 0x24c   :  { %v269_v32 = vpop.permute.xlu0 %268  ;;  %v2889_v38 = vpop.permute.xlu1 %742 }
 0x24d   :  { %2619 = vpow2.f32 %v368_v31  ;;  %v275_v34 = vsel %vm274_vm4, %v269_v32, %v256_v26 }
 0x24e   :  { %v2609_v36 = vpack.i.bf16 %v276_v33, %v275_v34  ;;  %2621 = vpow2.f32 %v264_v43  ;;  %v277_v46 = vmul.f32 %v275_v34, %v256_v26 }
 0x250   :  { %2610 = vrot.lane.b32.xlu0 %v2609_v36, %s2727_s14 }
 0x254   :  { %2615 = vrot.lane.b32.xlu0 %v2614_v39, %s2727_s14 }
 0x257   :  { %v2620_v40 = vpop.eup %2619 }
 0x258   :  { %393 = vrot.lane.b32.xlu0 %v2620_v40, %s2728_s2  ;;  %v2622_v59 = vpop.eup %2621 }
 0x2c2   :  { %v2611_v44 = vpop.permute.xlu0 %2610 }
 0x2c3   :  { %v2613_v47 = vunpack.i.h.bf16 %v2611_v44  ;;  %v2612_v48 = vunpack.i.l.bf16 %v2611_v44 }
 0x2c5   :  { %v289_v49 = vsel %vm287_vm5, %v278_v45, %v2613_v47  ;;  %v288_v50 = vsel %vm287_vm5, %v277_v46, %v2612_v48 }
 0x2c6   :  { %v2497_v51 = vpack.c.bf16 %v289_v49, %v288_v50  ;;  %v2616_v52 = vpop.permute.xlu0 %2615 }
 0x2c7   :  { %v2618_v55 = vunpack.i.h.bf16 %v2616_v52  ;;  %v2617_v56 = vunpack.i.l.bf16 %v2616_v52 }
 0x2c8   :  { %2498 = vmatpush3.bf16.msra.mxu0 %v2497_v51 }
 0x2c9   :  { %v391_v57 = vsel %vm287_vm5, %v381_v54, %v2618_v55  ;;  %v390_v58 = vsel %vm287_vm5, %v380_v53, %v2617_v56  ;;  %2499 = vmatprep.subr.bf16.mxu0 %v2723_v2 }
 0x2ca   :  { %v2500_v60 = vpack.c.bf16 %v391_v57, %v390_v58  ;;  %v394_v61 = vpop.permute.xlu0 %393 }
 0x2cb   :  { %2324 = vmatmul.mubr.msk.f32.vlgmr.msra.gmra.mrb[4].mxu0 %vm181_vm2, %v2622_v59 }
 0x2cc   :  { %2501 = vmatpush3.bf16.msra.mxu0 %v2500_v60  ;;  %2330 = vmatprep.mubr.msk.f32.mxu0 %vm2724_vm1, %v2725_v3 }
 0x2cf   :  { %2331 = vmatmul.mubr.msk.f32.vlgmr.msra.gmra.mrb[6].mxu0 %vm181_vm2, %v394_v61 }
 0x2d0   :  { %2342 = vmatprep.mubr.msk.f32.mxu0 %vm181_vm2, %v568_v13 }
 0x39e   :  { %v359_v62 = vpop.f32.mrb[4].mxu0 }
 0x39f   :  { %v467_v63 = vmax.f32 %v359_v62, 1e-30  ;;  %v2325_v0 = vpop.f32.mrb[5].mxu0 }
 0x3a1   :  { %471 = vrot.lane.b32.xlu0 %v467_v63, %s2729_s15 }
 0x3a2   :  { %v463_v1 = vpop.f32.mrb[6].mxu0 }
 0x3a3   :  { %v468_v4 = vmax.f32 %v463_v1, 1e-30  ;;  %v2332_v5 = vpop.f32.mrb[7].mxu0 }
 0x3a5   :  { %473 = vrot.lane.b32.xlu0 %v468_v4, %s2729_s15 }
 0x3a9   :  { %775 = vrot.lane.b32.xlu0 %v2172_v20, %s2731_s5 }
 0x413   :  { %v472_v7 = vpop.permute.xlu0 %471 }
 0x414   :  { %2623 = vrcp.f32 %v472_v7 }
 0x417   :  { %v474_v8 = vpop.permute.xlu0 %473 }
 0x418   :  { %2625 = vrcp.f32 %v474_v8 }
 0x41b   :  { %v2884_v30 = vpop.permute.xlu0 %775 }
 0x41e   :  { %v2624_v9 = vpop.eup %2623 }
 0x41f   :  { %v478_v10 = vmul.f32 %v2624_v9, %v359_v62 }
 0x421   :  { %2335 = vmatprep.mubr.msk.f32.mxu1 %vm287_vm5, %v478_v10 }
 0x422   :  { %v2626_v11 = vpop.eup %2625 }
 0x423   :  { %v480_v12 = vmul.f32 %v2626_v11, %v463_v1 }
 0x425   :  { %2336 = vmatmul.mubr.msk.f32.vlgmr.msra.gmra.mrb[2].mxu1 %vm287_vm5, %v480_v12 }
 0x426   :  { %2375 = vmatprep.mubr.msk.f32.mxu1 %vm2724_vm1, %v2725_v3  ;;  %2520 = vmatpush3.bf16.msra.mxu1 %v2841_v16 }
 0x427   :  { %2521 = vmatprep.subr.bf16.mxu1 %v2723_v2 }
 0x42a   :  { %2523 = vmatpush3.bf16.msra.mxu1 %v2851_v19 }
 0x42b   :  { %2530 = vmatprep.subr.bf16.mxu1 %v2723_v2 }
 0x4f8   :  { %v2337_v22 = vpop.f32.mrb[2].mxu1 }
 0x4f9   :  { %v565_v23 = vadd.f32 %v2337_v22, %v2166_v21  ;;  %v559_v24 = vpop.f32.mrb[3].mxu1 }
 0x4fa   :  { %v560_v25 = vadd.f32 %v2166_v21, %v559_v24 }
 0x4fc   :  { %v2502_v26 = vpack.c.bf16 %v565_v23, %v560_v25 }
 0x4fe   :  { %2503 = vmatprep.subr.bf16.mxu0 %v2502_v26 }
 0x4ff   :  { %2505 = vmatpush3.bf16.msra.mxu0 %v2502_v26 }
 0x500   :  { %2506 = vmatprep.subr.bf16.mxu0 %v2723_v2 }
 0x502   :  { %2343 = vmatmul.mubr.msk.f32.vlgmr.msra.gmra.mrb[8].mxu0 %vm181_vm2, %v569_v27 }
 0x503   :  { %2508 = vmatpush3.bf16.msra.mxu0 %v2841_v16  ;;  %2353 = vmatprep.mubr.msk.f32.mxu0 %vm2724_vm1, %v2725_v3 }
 0x504   :  { %2509 = vmatprep.subr.bf16.mxu0 %v2723_v2 }
 0x507   :  { %2511 = vmatpush3.bf16.msra.mxu0 %v2851_v19 }
 0x508   :  { %2512 = vmatprep.subr.bf16.mxu0 %v2723_v2 }
 0x50a   :  { %2354 = vmatmul.mubr.f32.vlgmr.msra.gmra.mrb[10].mxu0 %v2725_v3 }
 0x50b   :  { %2514 = vmatpush3.bf16.msra.mxu0 %v2841_v16  ;;  %2364 = vmatprep.mubr.msk.f32.mxu0 %vm2724_vm1, %v2725_v3 }
 0x50c   :  { %2515 = vmatprep.subr.bf16.mxu0 %v2723_v2 }
 0x50f   :  { %2517 = vmatpush3.bf16.msra.mxu0 %v2851_v19 }
 0x510   :  { %2524 = vmatprep.subr.bf16.mxu0 %v2723_v2 }
 0x5d5   :  { %v2880_v28 = vpop.f32.mrb[8].mxu0 }
 0x5d6   :  { %v2882_v29 = vpop.f32.mrb[9].mxu0 }
 0x5dd   :  { %v726_v31 = vpop.f32.mrb[10].mxu0 }
 0x5de   :  { %v730_v32 = vadd.f32 %v726_v31, %v2882_v29  ;;  %v766_v33 = vrot.slane %v726_v31, 2  ;;  %v2355_v34 = vpop.f32.mrb[11].mxu0  ;;  %v778_v35 = vadd.f32 %v2884_v30, %v726_v31  ;;  %v745_v39 = vadd.f32 %v2889_v38, %v726_v31 }
 0x5e0   :  { %v768_v36 = vadd.f32 %v2880_v28, %v766_v33  ;;  %v780_v37 = vrot.slane %v778_v35, 2  ;;  %v2171_v41 = vmul.f32 -1.442695, %v730_v32 }
 0x5e2   :  { %781 = vrot.lane.b32.xlu0 %v780_v37, %s2732_s9  ;;  %v2173_v40 = vmul.f32 -1.442695, %v768_v36 }
 0x5e4   :  { %2627 = vpow2.f32 %v2173_v40 }
 0x5e5   :  { %2629 = vpow2.f32 %v2171_v41 }
 0x5e6   :  { %747 = vrot.lane.b32.xlu0 %v745_v39, %s2732_s9 }
 0x5ee   :  { %v2628_v42 = vpop.eup %2627 }
 0x5ef   :  { %v772_v43 = vadd.f32 1.0, %v2628_v42  ;;  %v2630_v44 = vpop.eup %2629 }
 0x5f0   :  { %v734_v45 = vadd.f32 1.0, %v2630_v44 }
 0x5f1   :  { %2631 = vrcp.f32 %v772_v43 }
 0x5f2   :  { %2633 = vrcp.f32 %v734_v45 }
 0x5fb   :  { %v2632_v46 = vpop.eup %2631 }
 0x5fc   :  { %v2634_v49 = vpop.eup %2633  ;;  %v791_v58 = vsub.f32 1.0, %v2632_v46  ;;  %v797_v60 = vmul.f32 0.0, %v2632_v46 }
 0x5fd   :  { %v757_v63 = vsub.f32 1.0, %v2634_v49  ;;  %v763_v1 = vmul.f32 0.0, %v2634_v49 }
 0x654   :  { %v782_v47 = vpop.permute.xlu0 %781 }
 0x655   :  { %v784_v48 = vmul.f32 %v2632_v46, %v782_v47 }
 0x657   :  { %786 = vrot.lane.b32.xlu0 %v784_v48, %s2730_s30 }
 0x658   :  { %v748_v50 = vpop.permute.xlu0 %747 }
 0x659   :  { %v750_v51 = vmul.f32 %v2634_v49, %v748_v50 }
 0x65b   :  { %752 = vrot.lane.b32.xlu0 %v750_v51, %s2730_s30 }
 0x6c9   :  { %v787_v52 = vpop.permute.xlu0 %786 }
 0x6ca   :  { %v789_v53 = vadd.f32 %v2880_v28, %v787_v52 }
 0x6cc   :  { %2635 = vtanh.f32 %v789_v53 }
 0x6cd   :  { %v753_v54 = vpop.permute.xlu0 %752 }
 0x6ce   :  { %v755_v55 = vadd.f32 %v753_v54, %v2882_v29 }
 0x6d0   :  { %2637 = vtanh.f32 %v755_v55 }
 0x6d6   :  { %v2636_v56 = vpop.eup %2635 }
 0x6d7   :  { %793 = vrot.lane.b32.xlu1 %v2636_v56, %s2728_s2 }
 0x6da   :  { %v2638_v57 = vpop.eup %2637 }
 0x6db   :  { %759 = vrot.lane.b32.xlu0 %v2638_v57, %s2728_s2 }
 0x749   :  { %v794_v59 = vpop.permute.xlu1 %793 }
 0x74a   :  { %v796_v61 = vmul.f32 %v794_v59, %v791_v58 }
 0x74c   :  { %v2900_v62 = vadd.f32 %v797_v60, %v796_v61 }
 0x74d   :  { %v760_v0 = vpop.permute.xlu0 %759 }
 0x74e   :  { %v762_v4 = vmul.f32 %v760_v0, %v757_v63  ;;  %v811_v5 = vrot.slane %v2900_v62, 6  ;;  %v950_v45 = vrot.slane %v2900_v62, 2 }
 0x750   :  { %v2903_v6 = vadd.f32 %v763_v1, %v762_v4  ;;  %812 = vrot.lane.b32.xlu0 %v811_v5, %s2733_s10 }
 0x752   :  { %800 = vrot.lane.b32.xlu1 %v2903_v6, %s2728_s2  ;;  %v918_v46 = vrot.slane %v2903_v6, 6 }
 0x7c2   :  { %v813_v7 = vpop.permute.xlu0 %812 }
 0x7c4   :  { %v801_v8 = vpop.permute.xlu1 %800 }
 0x7c5   :  { %804 = vst.msk [vmem:[#allocation2] sm:$0x3] %vm803_vm6, %v801_v8  ;;  %v815_v9 = vsel %vm181_vm2, %v801_v8, %v813_v7 }
 0x7c6   :  { %2365 = vmatmul.mubr.msk.f32.vlgmr.msra.gmra.mrb[12].mxu0 %vm656_vm7, %v815_v9 }
 0x7c7   :  { %2526 = vmatpush3.bf16.msra.mxu0 %v2841_v16  ;;  %2386 = vmatprep.mubr.msk.f32.mxu0 %vm2724_vm1, %v2725_v3 }
 0x7c8   :  { %2527 = vmatprep.subr.bf16.mxu0 %v2723_v2 }
 0x7cb   :  { %2529 = vmatpush3.bf16.msra.mxu0 %v2851_v19 }
 0x7cc   :  { %2536 = vmatprep.subr.bf16.mxu0 %v2723_v2 }
 0x899   :  { %v885_v10 = vpop.f32.mrb[12].mxu0 }
 0x89a   :  { %v890_v11 = vrot.slane %v885_v10, 6  ;;  %v922_v12 = vrot.slane %v885_v10, 4  ;;  %v2366_v13 = vpop.f32.mrb[13].mxu0  ;;  %v931_v14 = vadd.f32 %v885_v10, %v2884_v30  ;;  %v899_v15 = vadd.f32 %v885_v10, %v2889_v38 }
 0x89c   :  { %v892_v17 = vadd.f32 %v890_v11, %v2882_v29  ;;  %v924_v18 = vadd.f32 %v2880_v28, %v922_v12  ;;  %v933_v20 = vrot.slane %v931_v14, 4  ;;  %v901_v21 = vrot.slane %v899_v15, 6 }
 0x89e   :  { %934 = vrot.lane.b32.xlu1 %v933_v20, %s2732_s9  ;;  %902 = vrot.lane.b32.xlu0 %v901_v21, %s2732_s9  ;;  %v2175_v22 = vmul.f32 -1.442695, %v892_v17  ;;  %v2176_v23 = vmul.f32 -1.442695, %v924_v18 }
 0x8a0   :  { %2639 = vpow2.f32 %v2175_v22 }
 0x8a1   :  { %2641 = vpow2.f32 %v2176_v23 }
 0x8aa   :  { %v2640_v24 = vpop.eup %2639 }
 0x8ab   :  { %v2642_v25 = vpop.eup %2641  ;;  %v896_v26 = vadd.f32 1.0, %v2640_v24 }
 0x8ac   :  { %v928_v27 = vadd.f32 1.0, %v2642_v25 }
 0x8ad   :  { %2643 = vrcp.f32 %v896_v26 }
 0x8ae   :  { %2645 = vrcp.f32 %v928_v27 }
 0x8b7   :  { %v2644_v31 = vpop.eup %2643 }
 0x8b8   :  { %v2646_v32 = vpop.eup %2645  ;;  %v912_v48 = vsub.f32 1.0, %v2644_v31  ;;  %v920_v52 = vmul.f32 %v2644_v31, %v918_v46 }
 0x8b9   :  { %v944_v44 = vsub.f32 1.0, %v2646_v32  ;;  %v952_v49 = vmul.f32 %v2646_v32, %v950_v45 }
 0x910   :  { %v935_v33 = vpop.permute.xlu1 %934  ;;  %v903_v34 = vpop.permute.xlu0 %902 }
 0x911   :  { %v937_v35 = vmul.f32 %v2646_v32, %v935_v33  ;;  %v905_v36 = vmul.f32 %v2644_v31, %v903_v34 }
 0x913   :  { %939 = vrot.lane.b32.xlu1 %v937_v35, %s2730_s30  ;;  %907 = vrot.lane.b32.xlu0 %v905_v36, %s2730_s30 }
 0x985   :  { %v940_v37 = vpop.permute.xlu1 %939  ;;  %v908_v39 = vpop.permute.xlu0 %907 }
 0x986   :  { %v942_v40 = vadd.f32 %v2880_v28, %v940_v37  ;;  %v910_v41 = vadd.f32 %v908_v39, %v2882_v29 }
 0x988   :  { %2647 = vtanh.f32 %v942_v40 }
 0x989   :  { %2649 = vtanh.f32 %v910_v41 }
 0x992   :  { %v2648_v42 = vpop.eup %2647 }
 0x993   :  { %v2650_v43 = vpop.eup %2649  ;;  %946 = vrot.lane.b32.xlu1 %v2648_v42, %s2728_s2 }
 0x994   :  { %914 = vrot.lane.b32.xlu0 %v2650_v43, %s2728_s2 }
 0xa05   :  { %v947_v47 = vpop.permute.xlu1 %946 }
 0xa06   :  { %v949_v50 = vmul.f32 %v947_v47, %v944_v44  ;;  %v915_v51 = vpop.permute.xlu0 %914 }
 0xa07   :  { %v917_v53 = vmul.f32 %v915_v51, %v912_v48 }
 0xa08   :  { %v2931_v54 = vadd.f32 %v952_v49, %v949_v50 }
 0xa09   :  { %v2933_v55 = vadd.f32 %v920_v52, %v917_v53 }
 0xa0a   :  { %v966_v56 = vrot.slane %v2931_v54, 2 }
 0xa0b   :  { %955 = vrot.lane.b32.xlu1 %v2933_v55, %s2728_s2  ;;  %v1074_v34 = vrot.slane %v2933_v55, 6 }
 0xa0c   :  { %967 = vrot.lane.b32.xlu0 %v966_v56, %s2733_s10 }
 0xa7d   :  { %v956_v57 = vpop.permute.xlu1 %955 }
 0xa7e   :  { %959 = vst.msk [vmem:[#allocation2] sm:$0xc] %vm958_vm8, %v956_v57  ;;  %v968_v58 = vpop.permute.xlu0 %967 }
 0xa7f   :  { %v970_v59 = vsel %vm181_vm2, %v956_v57, %v968_v58 }
 0xa80   :  { %v972_v60 = vrot.slane %v970_v59, 2 }
 0xa82   :  { %2376 = vmatmul.mubr.msk.f32.vlgmr.msra.gmra.mrb[4].mxu1 %vm656_vm7, %v972_v60 }
 0xa83   :  { %2532 = vmatpush3.bf16.msra.mxu1 %v2841_v16  ;;  %2397 = vmatprep.mubr.msk.f32.mxu1 %vm2724_vm1, %v2725_v3 }
 0xa84   :  { %2533 = vmatprep.subr.bf16.mxu1 %v2723_v2 }
 0xa87   :  { %2535 = vmatpush3.bf16.msra.mxu1 %v2851_v19 }
 0xa88   :  { %2542 = vmatprep.subr.bf16.mxu1 %v2723_v2 }
 0xb55   :  { %v1041_v61 = vpop.f32.mrb[4].mxu1 }
 0xb56   :  { %v1046_v63 = vrot.slane %v1041_v61, 4  ;;  %v1078_v0 = vrot.slane %v1041_v61, 6  ;;  %v2377_v1 = vpop.f32.mrb[5].mxu1  ;;  %v1087_v4 = vadd.f32 %v1041_v61, %v2884_v30  ;;  %v1055_v5 = vadd.f32 %v1041_v61, %v2889_v38 }
 0xb58   :  { %v1048_v6 = vadd.f32 %v1046_v63, %v2882_v29  ;;  %v1080_v7 = vadd.f32 %v2880_v28, %v1078_v0  ;;  %v1089_v8 = vrot.slane %v1087_v4, 6  ;;  %v1057_v9 = vrot.slane %v1055_v5, 4 }
 0xb5a   :  { %1090 = vrot.lane.b32.xlu1 %v1089_v8, %s2732_s9  ;;  %1058 = vrot.lane.b32.xlu0 %v1057_v9, %s2732_s9  ;;  %v2178_v10 = vmul.f32 -1.442695, %v1048_v6  ;;  %v2179_v11 = vmul.f32 -1.442695, %v1080_v7 }
 0xb5c   :  { %2651 = vpow2.f32 %v2178_v10 }
 0xb5d   :  { %2653 = vpow2.f32 %v2179_v11 }
 0xb66   :  { %v2652_v12 = vpop.eup %2651 }
 0xb67   :  { %v2654_v13 = vpop.eup %2653  ;;  %v1052_v14 = vadd.f32 1.0, %v2652_v12 }
 0xb68   :  { %v1084_v15 = vadd.f32 1.0, %v2654_v13 }
 0xb69   :  { %2655 = vrcp.f32 %v1052_v14 }
 0xb6a   :  { %2657 = vrcp.f32 %v1084_v15 }
 0xb73   :  { %v2656_v17 = vpop.eup %2655 }
 0xb74   :  { %v2658_v18 = vpop.eup %2657  ;;  %v1068_v36 = vsub.f32 1.0, %v2656_v17  ;;  %v1076_v41 = vmul.f32 %v2656_v17, %v1074_v34 }
 0xb75   :  { %v1100_v33 = vsub.f32 1.0, %v2658_v18  ;;  %v1107_v37 = vmul.f32 %v2658_v18, %v966_v56 }
 0xbcc   :  { %v1091_v20 = vpop.permute.xlu1 %1090  ;;  %v1059_v21 = vpop.permute.xlu0 %1058 }
 0xbcd   :  { %v1093_v22 = vmul.f32 %v2658_v18, %v1091_v20  ;;  %v1061_v23 = vmul.f32 %v2656_v17, %v1059_v21 }
 0xbcf   :  { %1095 = vrot.lane.b32.xlu1 %v1093_v22, %s2730_s30  ;;  %1063 = vrot.lane.b32.xlu0 %v1061_v23, %s2730_s30 }
 0xc41   :  { %v1096_v24 = vpop.permute.xlu1 %1095  ;;  %v1064_v25 = vpop.permute.xlu0 %1063 }
 0xc42   :  { %v1098_v26 = vadd.f32 %v2880_v28, %v1096_v24  ;;  %v1066_v27 = vadd.f32 %v1064_v25, %v2882_v29 }
 0xc44   :  { %2659 = vtanh.f32 %v1098_v26 }
 0xc45   :  { %2661 = vtanh.f32 %v1066_v27 }
 0xc4e   :  { %v2660_v31 = vpop.eup %2659 }
 0xc4f   :  { %v2662_v32 = vpop.eup %2661  ;;  %1102 = vrot.lane.b32.xlu1 %v2660_v31, %s2728_s2 }
 0xc50   :  { %1070 = vrot.lane.b32.xlu0 %v2662_v32, %s2728_s2 }
 0xcc1   :  { %v1103_v35 = vpop.permute.xlu1 %1102 }
 0xcc2   :  { %v1105_v39 = vmul.f32 %v1103_v35, %v1100_v33  ;;  %v1071_v40 = vpop.permute.xlu0 %1070 }
 0xcc3   :  { %v1073_v42 = vmul.f32 %v1071_v40, %v1068_v36 }
 0xcc4   :  { %v2961_v43 = vadd.f32 %v1107_v37, %v1105_v39 }
 0xcc5   :  { %v2963_v44 = vadd.f32 %v1076_v41, %v1073_v42 }
 0xcc6   :  { %v1121_v45 = vrot.slane %v2961_v43, 6  ;;  %v1258_v18 = vrot.slane %v2961_v43, 2 }
 0xcc7   :  { %1110 = vrot.lane.b32.xlu1 %v2963_v44, %s2728_s2  ;;  %v1229_v21 = vrot.slane %v2963_v44, 6 }
 0xcc8   :  { %1122 = vrot.lane.b32.xlu0 %v1121_v45, %s2733_s10 }
 0xd39   :  { %v1111_v46 = vpop.permute.xlu1 %1110 }
 0xd3a   :  { %1114 = vst.msk [vmem:[#allocation2] sm:$0x30] %vm1113_vm9, %v1111_v46  ;;  %v1123_v47 = vpop.permute.xlu0 %1122 }
 0xd3b   :  { %v1125_v48 = vsel %vm181_vm2, %v1111_v46, %v1123_v47 }
 0xd3c   :  { %v1127_v49 = vrot.slane %v1125_v48, 4 }
 0xd3e   :  { %2387 = vmatmul.mubr.msk.f32.vlgmr.msra.gmra.mrb[14].mxu0 %vm656_vm7, %v1127_v49 }
 0xd3f   :  { %2538 = vmatpush3.bf16.msra.mxu0 %v2841_v16  ;;  %2408 = vmatprep.mubr.msk.f32.mxu0 %vm2724_vm1, %v2725_v3 }
 0xd40   :  { %2539 = vmatprep.subr.bf16.mxu0 %v2723_v2 }
 0xd43   :  { %2541 = vmatpush3.bf16.msra.mxu0 %v2851_v19 }
 0xd44   :  { %2548 = vmatprep.subr.bf16.mxu0 %v2723_v2 }
 0xe11   :  { %v1196_v50 = vpop.f32.mrb[14].mxu0 }
 0xe12   :  { %v1201_v51 = vrot.slane %v1196_v50, 2  ;;  %v1233_v52 = vadd.f32 %v2880_v28, %v1196_v50  ;;  %v2388_v53 = vpop.f32.mrb[15].mxu0  ;;  %v1240_v55 = vadd.f32 %v1196_v50, %v2884_v30  ;;  %v1210_v56 = vadd.f32 %v1196_v50, %v2889_v38 }
 0xe14   :  { %v1203_v57 = vadd.f32 %v1201_v51, %v2882_v29  ;;  %1242 = vrot.lane.b32.xlu1 %v1240_v55, %s2732_s9  ;;  %v1212_v58 = vrot.slane %v1210_v56, 2  ;;  %v2182_v59 = vmul.f32 -1.442695, %v1233_v52 }
 0xe16   :  { %1213 = vrot.lane.b32.xlu0 %v1212_v58, %s2732_s9  ;;  %v2181_v60 = vmul.f32 -1.442695, %v1203_v57  ;;  %2663 = vpow2.f32 %v2182_v59 }
 0xe18   :  { %2665 = vpow2.f32 %v2181_v60 }
 0xe20   :  { %v2664_v61 = vpop.eup %2663 }
 0xe21   :  { %v1237_v0 = vadd.f32 1.0, %v2664_v61 }
 0xe22   :  { %v2666_v63 = vpop.eup %2665 }
 0xe23   :  { %v1207_v1 = vadd.f32 1.0, %v2666_v63  ;;  %2667 = vrcp.f32 %v1237_v0 }
 0xe25   :  { %2669 = vrcp.f32 %v1207_v1 }
 0xe2d   :  { %v2668_v4 = vpop.eup %2667 }
 0xe2e   :  { %v1252_v17 = vsub.f32 1.0, %v2668_v4  ;;  %v1260_v22 = vmul.f32 %v2668_v4, %v1258_v18 }
 0xe2f   :  { %v2670_v7 = vpop.eup %2669 }
 0xe30   :  { %v1223_v24 = vsub.f32 1.0, %v2670_v7  ;;  %v1231_v27 = vmul.f32 %v2670_v7, %v1229_v21 }
 0xe86   :  { %v1243_v5 = vpop.permute.xlu1 %1242 }
 0xe87   :  { %v1245_v6 = vmul.f32 %v2668_v4, %v1243_v5 }
 0xe88   :  { %v1214_v8 = vpop.permute.xlu0 %1213 }
 0xe89   :  { %v1216_v9 = vmul.f32 %v2670_v7, %v1214_v8  ;;  %1247 = vrot.lane.b32.xlu1 %v1245_v6, %s2730_s30 }
 0xe8b   :  { %1218 = vrot.lane.b32.xlu0 %v1216_v9, %s2730_s30 }
 0xefb   :  { %v1248_v10 = vpop.permute.xlu1 %1247 }
 0xefc   :  { %v1250_v11 = vadd.f32 %v2880_v28, %v1248_v10 }
 0xefd   :  { %v1219_v12 = vpop.permute.xlu0 %1218 }
 0xefe   :  { %2671 = vtanh.f32 %v1250_v11  ;;  %v1221_v13 = vadd.f32 %v1219_v12, %v2882_v29 }
 0xf00   :  { %2673 = vtanh.f32 %v1221_v13 }
 0xf08   :  { %v2672_v14 = vpop.eup %2671 }
 0xf09   :  { %1254 = vrot.lane.b32.xlu1 %v2672_v14, %s2728_s2 }
 0xf0a   :  { %v2674_v15 = vpop.eup %2673 }
 0xf0b   :  { %1225 = vrot.lane.b32.xlu0 %v2674_v15, %s2728_s2 }
 0xf7b   :  { %v1255_v20 = vpop.permute.xlu1 %1254 }
 0xf7c   :  { %v1257_v23 = vmul.f32 %v1255_v20, %v1252_v17 }
 0xf7d   :  { %v1226_v25 = vpop.permute.xlu0 %1225 }
 0xf7e   :  { %v2992_v26 = vadd.f32 %v1260_v22, %v1257_v23  ;;  %v1228_v31 = vmul.f32 %v1226_v25, %v1223_v24 }
 0xf80   :  { %v1232_v32 = vadd.f32 %v1231_v27, %v1228_v31  ;;  %v1274_v33 = vrot.slane %v2992_v26, 2 }
 0xf82   :  { %1275 = vrot.lane.b32.xlu0 %v1274_v33, %s2733_s10  ;;  %1263 = vrot.lane.b32.xlu1 %v1232_v32, %s2728_s2  ;;  %v1378_v6 = vrot.slane %v1232_v32, 6 }
 0xff4   :  { %v1264_v34 = vpop.permute.xlu1 %1263  ;;  %v1276_v35 = vpop.permute.xlu0 %1275 }
 0xff5   :  { %1267 = vst.msk [vmem:[#allocation2] sm:$0xc0] %vm1266_vm10, %v1264_v34  ;;  %v1278_v36 = vsel %vm181_vm2, %v1264_v34, %v1276_v35 }
 0xff6   :  { %v1280_v37 = vrot.slane %v1278_v36, 6 }
 0xff8   :  { %2398 = vmatmul.mubr.msk.f32.vlgmr.msra.gmra.mrb[6].mxu1 %vm656_vm7, %v1280_v37 }
 0xff9   :  { %2544 = vmatpush3.bf16.msra.mxu1 %v2841_v16  ;;  %2419 = vmatprep.mubr.msk.f32.mxu1 %vm2724_vm1, %v2725_v3 }
 0xffa   :  { %2545 = vmatprep.subr.bf16.mxu1 %v2723_v2 }
 0xffd   :  { %2547 = vmatpush3.bf16.msra.mxu1 %v2851_v19 }
0x10cb   :  { %v1349_v39 = vpop.f32.mrb[6].mxu1 }
0x10cc   :  { %v1353_v40 = vadd.f32 %v2880_v28, %v1349_v39  ;;  %v1383_v41 = vrot.slane %v1349_v39, 2  ;;  %v2399_v42 = vpop.f32.mrb[7].mxu1  ;;  %v1360_v44 = vadd.f32 %v1349_v39, %v2889_v38  ;;  %v1392_v45 = vadd.f32 %v1349_v39, %v2884_v30 }
0x10ce   :  { %v1385_v46 = vadd.f32 %v1383_v41, %v2882_v29  ;;  %1362 = vrot.lane.b32.xlu0 %v1360_v44, %s2732_s9  ;;  %v1394_v47 = vrot.slane %v1392_v45, 2  ;;  %v2184_v48 = vmul.f32 -1.442695, %v1353_v40 }
0x10d0   :  { %1395 = vrot.lane.b32.xlu1 %v1394_v47, %s2732_s9  ;;  %v2185_v49 = vmul.f32 -1.442695, %v1385_v46  ;;  %2675 = vpow2.f32 %v2184_v48 }
0x10d2   :  { %2677 = vpow2.f32 %v2185_v49 }
0x10da   :  { %v2676_v50 = vpop.eup %2675 }
0x10db   :  { %v1357_v52 = vadd.f32 1.0, %v2676_v50 }
0x10dc   :  { %v2678_v51 = vpop.eup %2677 }
0x10dd   :  { %v1389_v53 = vadd.f32 1.0, %v2678_v51  ;;  %2679 = vrcp.f32 %v1357_v52 }
0x10df   :  { %2681 = vrcp.f32 %v1389_v53 }
0x10e7   :  { %v2680_v55 = vpop.eup %2679 }
0x10e8   :  { %v1372_v7 = vsub.f32 1.0, %v2680_v55  ;;  %v1380_v9 = vmul.f32 %v2680_v55, %v1378_v6 }
0x10e9   :  { %v2682_v58 = vpop.eup %2681 }
0x10ea   :  { %v1405_v11 = vsub.f32 1.0, %v2682_v58  ;;  %v1412_v14 = vmul.f32 %v2682_v58, %v1274_v33 }
0x1140   :  { %v1363_v56 = vpop.permute.xlu0 %1362 }
0x1141   :  { %v1365_v57 = vmul.f32 %v2680_v55, %v1363_v56 }
0x1142   :  { %v1396_v59 = vpop.permute.xlu1 %1395 }
0x1143   :  { %v1398_v60 = vmul.f32 %v2682_v58, %v1396_v59  ;;  %1367 = vrot.lane.b32.xlu0 %v1365_v57, %s2730_s30 }
0x1145   :  { %1400 = vrot.lane.b32.xlu1 %v1398_v60, %s2730_s30 }
0x11b5   :  { %v1368_v61 = vpop.permute.xlu0 %1367 }
0x11b6   :  { %v1370_v63 = vadd.f32 %v2880_v28, %v1368_v61 }
0x11b7   :  { %v1401_v0 = vpop.permute.xlu1 %1400 }
0x11b8   :  { %2683 = vtanh.f32 %v1370_v63  ;;  %v1403_v1 = vadd.f32 %v1401_v0, %v2882_v29 }
0x11ba   :  { %2685 = vtanh.f32 %v1403_v1 }
0x11c2   :  { %v2684_v4 = vpop.eup %2683 }
0x11c3   :  { %1374 = vrot.lane.b32.xlu0 %v2684_v4, %s2728_s2 }
0x11c4   :  { %v2686_v5 = vpop.eup %2685 }
0x11c5   :  { %1407 = vrot.lane.b32.xlu1 %v2686_v5, %s2728_s2 }
0x1235   :  { %v1375_v8 = vpop.permute.xlu0 %1374 }
0x1236   :  { %v1377_v10 = vmul.f32 %v1375_v8, %v1372_v7 }
0x1237   :  { %v1408_v12 = vpop.permute.xlu1 %1407 }
0x1238   :  { %v3017_v13 = vadd.f32 %v1380_v9, %v1377_v10  ;;  %v1410_v15 = vmul.f32 %v1408_v12, %v1405_v11 }
0x123a   :  { %v3019_v17 = vadd.f32 %v1412_v14, %v1410_v15  ;;  %1415 = vrot.lane.b32.xlu1 %v3017_v13, %s2728_s2  ;;  %v1531_v56 = vrot.slane %v3017_v13, 6 }
0x123c   :  { %v1424_v18 = vrot.slane %v3019_v17, 6  ;;  %v1563_v55 = vrot.slane %v3019_v17, 2 }
0x123e   :  { %1425 = vrot.lane.b32.xlu0 %v1424_v18, %s2733_s10 }
0x12ac   :  { %v3025_v20 = vpop.permute.xlu1 %1415 }
0x12b0   :  { %v1426_v21 = vpop.permute.xlu0 %1425 }
0x12b1   :  { %v1428_v22 = vsel %vm181_vm2, %v3025_v20, %v1426_v21 }
0x12b2   :  { %2409 = vmatmul.mubr.msk.f32.vlgmr.msra.gmra.mrb[16].mxu0 %vm656_vm7, %v1428_v22 }
0x12b3   :  { %2550 = vmatpush3.bf16.msra.mxu0 %v2841_v16  ;;  %2430 = vmatprep.mubr.msk.f32.mxu0 %vm2724_vm1, %v2725_v3 }
0x12b4   :  { %2551 = vmatprep.subr.bf16.mxu0 %v2723_v2 }
0x12b7   :  { %2553 = vmatpush3.bf16.msra.mxu0 %v2851_v19 }
0x1385   :  { %v1498_v23 = vpop.f32.mrb[16].mxu0 }
0x1386   :  { %v1503_v24 = vrot.slane %v1498_v23, 6  ;;  %v1535_v25 = vrot.slane %v1498_v23, 4  ;;  %v2410_v27 = vpop.f32.mrb[17].mxu0  ;;  %v1544_v31 = vadd.f32 %v1498_v23, %v2884_v30  ;;  %v1512_v32 = vadd.f32 %v1498_v23, %v2889_v38 }
0x1388   :  { %v1505_v33 = vadd.f32 %v2880_v28, %v1503_v24  ;;  %v1537_v34 = vadd.f32 %v1535_v25, %v2882_v29  ;;  %v1546_v16 = vrot.slane %v1544_v31, 4  ;;  %v1514_v35 = vrot.slane %v1512_v32, 6 }
0x138a   :  { %1547 = vrot.lane.b32.xlu1 %v1546_v16, %s2732_s9  ;;  %1515 = vrot.lane.b32.xlu0 %v1514_v35, %s2732_s9  ;;  %v2187_v2 = vmul.f32 -1.442695, %v1505_v33  ;;  %v2188_v3 = vmul.f32 -1.442695, %v1537_v34 }
0x138c   :  { %2687 = vpow2.f32 %v2187_v2 }
0x138d   :  { %2689 = vpow2.f32 %v2188_v3 }
0x1396   :  { %v2688_v19 = vpop.eup %2687 }
0x1397   :  { %v2690_v36 = vpop.eup %2689  ;;  %v1509_v37 = vadd.f32 1.0, %v2688_v19 }
0x1398   :  { %v1541_v39 = vadd.f32 1.0, %v2690_v36 }
0x1399   :  { %2691 = vrcp.f32 %v1509_v37 }
0x139a   :  { %2693 = vrcp.f32 %v1541_v39 }
0x13a3   :  { %v2692_v40 = vpop.eup %2691 }
0x13a4   :  { %v2694_v41 = vpop.eup %2693  ;;  %v1525_v58 = vsub.f32 1.0, %v2692_v40  ;;  %v1533_v63 = vmul.f32 %v2692_v40, %v1531_v56 }
0x13a5   :  { %v1557_v53 = vsub.f32 1.0, %v2694_v41  ;;  %v1565_v59 = vmul.f32 %v2694_v41, %v1563_v55 }
0x13fc   :  { %v1548_v42 = vpop.permute.xlu1 %1547  ;;  %v1516_v44 = vpop.permute.xlu0 %1515 }
0x13fd   :  { %v1550_v45 = vmul.f32 %v2694_v41, %v1548_v42  ;;  %v1518_v46 = vmul.f32 %v2692_v40, %v1516_v44 }
0x13ff   :  { %1552 = vrot.lane.b32.xlu1 %v1550_v45, %s2730_s30  ;;  %1520 = vrot.lane.b32.xlu0 %v1518_v46, %s2730_s30 }
0x1471   :  { %v1553_v47 = vpop.permute.xlu1 %1552  ;;  %v1521_v48 = vpop.permute.xlu0 %1520 }
0x1472   :  { %v1555_v49 = vadd.f32 %v1553_v47, %v2882_v29  ;;  %v1523_v50 = vadd.f32 %v2880_v28, %v1521_v48 }
0x1474   :  { %2695 = vtanh.f32 %v1555_v49 }
0x1475   :  { %2697 = vtanh.f32 %v1523_v50 }
0x147e   :  { %v2696_v51 = vpop.eup %2695 }
0x147f   :  { %v2698_v52 = vpop.eup %2697  ;;  %1559 = vrot.lane.b32.xlu1 %v2696_v51, %s2728_s2 }
0x1480   :  { %1527 = vrot.lane.b32.xlu0 %v2698_v52, %s2728_s2 }
0x14f1   :  { %v1560_v57 = vpop.permute.xlu1 %1559 }
0x14f2   :  { %v1562_v60 = vmul.f32 %v1560_v57, %v1557_v53  ;;  %v1528_v61 = vpop.permute.xlu0 %1527 }
0x14f3   :  { %v1530_v0 = vmul.f32 %v1528_v61, %v1525_v58 }
0x14f4   :  { %v3049_v1 = vadd.f32 %v1565_v59, %v1562_v60 }
0x14f5   :  { %v1534_v4 = vadd.f32 %v1533_v63, %v1530_v0 }
0x14f6   :  { %v1577_v5 = vrot.slane %v3049_v1, 2 }
0x14f7   :  { %1568 = vrot.lane.b32.xlu1 %v1534_v4, %s2728_s2  ;;  %v1685_v45 = vrot.slane %v1534_v4, 6 }
0x14f8   :  { %1578 = vrot.lane.b32.xlu0 %v1577_v5, %s2733_s10 }
0x1569   :  { %v3054_v6 = vpop.permute.xlu1 %1568 }
0x156a   :  { %v1579_v7 = vpop.permute.xlu0 %1578 }
0x156b   :  { %v1581_v8 = vsel %vm181_vm2, %v3054_v6, %v1579_v7 }
0x156c   :  { %v1583_v9 = vrot.slane %v1581_v8, 2 }
0x156e   :  { %2420 = vmatmul.mubr.msk.f32.vlgmr.msra.gmra.mrb[8].mxu1 %vm656_vm7, %v1583_v9 }
0x1641   :  { %v1652_v10 = vpop.f32.mrb[8].mxu1 }
0x1642   :  { %v1657_v11 = vrot.slane %v1652_v10, 4  ;;  %v1689_v12 = vrot.slane %v1652_v10, 6  ;;  %v2421_v13 = vpop.f32.mrb[9].mxu1  ;;  %v1698_v14 = vadd.f32 %v1652_v10, %v2884_v30  ;;  %v1666_v15 = vadd.f32 %v1652_v10, %v2889_v38 }
0x1644   :  { %v1659_v18 = vadd.f32 %v2880_v28, %v1657_v11  ;;  %v1691_v21 = vadd.f32 %v1689_v12, %v2882_v29  ;;  %v1700_v22 = vrot.slane %v1698_v14, 6  ;;  %v1668_v23 = vrot.slane %v1666_v15, 4 }
0x1646   :  { %1701 = vrot.lane.b32.xlu1 %v1700_v22, %s2732_s9  ;;  %1669 = vrot.lane.b32.xlu0 %v1668_v23, %s2732_s9  ;;  %v2190_v24 = vmul.f32 -1.442695, %v1659_v18  ;;  %v2191_v25 = vmul.f32 -1.442695, %v1691_v21 }
0x1648   :  { %2699 = vpow2.f32 %v2190_v24 }
0x1649   :  { %2701 = vpow2.f32 %v2191_v25 }
0x1652   :  { %v2700_v27 = vpop.eup %2699 }
0x1653   :  { %v2702_v31 = vpop.eup %2701  ;;  %v1663_v32 = vadd.f32 1.0, %v2700_v27 }
0x1654   :  { %v1695_v33 = vadd.f32 1.0, %v2702_v31 }
0x1655   :  { %2703 = vrcp.f32 %v1663_v32 }
0x1656   :  { %2705 = vrcp.f32 %v1695_v33 }
0x165f   :  { %v2704_v34 = vpop.eup %2703 }
0x1660   :  { %v2706_v16 = vpop.eup %2705  ;;  %v1679_v47 = vsub.f32 1.0, %v2704_v34  ;;  %v1687_v51 = vmul.f32 %v2704_v34, %v1685_v45 }
0x1661   :  { %v1711_v44 = vsub.f32 1.0, %v2706_v16  ;;  %v1718_v48 = vmul.f32 %v2706_v16, %v1577_v5 }
0x16b8   :  { %v1702_v35 = vpop.permute.xlu1 %1701  ;;  %v1670_v2 = vpop.permute.xlu0 %1669 }
0x16b9   :  { %v1704_v3 = vmul.f32 %v2706_v16, %v1702_v35  ;;  %v1672_v19 = vmul.f32 %v2704_v34, %v1670_v2 }
0x16bb   :  { %1706 = vrot.lane.b32.xlu1 %v1704_v3, %s2730_s30  ;;  %1674 = vrot.lane.b32.xlu0 %v1672_v19, %s2730_s30 }
0x172d   :  { %v1707_v36 = vpop.permute.xlu1 %1706  ;;  %v1675_v37 = vpop.permute.xlu0 %1674 }
0x172e   :  { %v1709_v39 = vadd.f32 %v1707_v36, %v2882_v29  ;;  %v1677_v40 = vadd.f32 %v2880_v28, %v1675_v37 }
0x1730   :  { %2707 = vtanh.f32 %v1709_v39  ;;  %v1966_v39 = vld [vmem:[%s3207_s3 + $0x50] sm:$0xff] }
0x1731   :  { %2709 = vtanh.f32 %v1677_v40  ;;  %v1967_v40 = vld [vmem:[%s3207_s3 + $0x58] sm:$0xff] }
0x173a   :  { %v2708_v41 = vpop.eup %2707 }
0x173b   :  { %v2710_v42 = vpop.eup %2709  ;;  %1713 = vrot.lane.b32.xlu1 %v2708_v41, %s2728_s2  ;;  %v1968_v41 = vld [vmem:[%s3207_s3 + $0x60] sm:$0xff] }
0x173c   :  { %1681 = vrot.lane.b32.xlu0 %v2710_v42, %s2728_s2  ;;  %v2558_v42 = vpack.c.bf16 %v1967_v40, %v1966_v39 }
0x173e   :  { %2559 = vmatprep.subr.bf16.mxu0 %v2558_v42 }
0x17ad   :  { %v1714_v46 = vpop.permute.xlu1 %1713 }
0x17ae   :  { %v1716_v49 = vmul.f32 %v1714_v46, %v1711_v44  ;;  %v1682_v50 = vpop.permute.xlu0 %1681  ;;  %v1969_v44 = vld [vmem:[%s3207_s3 + $0x68] sm:$0xff] }
0x17af   :  { %v1684_v52 = vmul.f32 %v1682_v50, %v1679_v47  ;;  %v2562_v46 = vpack.c.bf16 %v1969_v44, %v1968_v41 }
0x17b0   :  { %v1719_v53 = vadd.f32 %v1718_v48, %v1716_v49 }
0x17b1   :  { %v3071_v55 = vadd.f32 %v1687_v51, %v1684_v52 }
0x17b2   :  { %v1730_v56 = vrot.slane %v1719_v53, 6 }
0x17b3   :  { %1721 = vrot.lane.b32.xlu1 %v3071_v55, %s2728_s2  ;;  %v1838_v34 = vrot.slane %v3071_v55, 6  ;;  %v2058_v55 = vld [vmem:[%s3207_s3 + $0x70] sm:$0xff] }
0x17b4   :  { %1731 = vrot.lane.b32.xlu0 %v1730_v56, %s2733_s10  ;;  %v2059_v56 = vld [vmem:[%s3207_s3 + $0x78] sm:$0xff] }
0x1825   :  { %v3076_v57 = vpop.permute.xlu1 %1721 }
0x1826   :  { %v1732_v58 = vpop.permute.xlu0 %1731 }
0x1827   :  { %v1734_v59 = vsel %vm181_vm2, %v3076_v57, %v1732_v58  ;;  %v2566_v58 = vpack.c.bf16 %v2059_v56, %v2058_v55 }
0x1828   :  { %v1736_v60 = vrot.slane %v1734_v59, 4  ;;  %v2061_v59 = vld [vmem:[%s3207_s3 + $0x88] sm:$0xff] }
0x182a   :  { %2431 = vmatmul.mubr.msk.f32.vlgmr.msra.gmra.mrb[18].mxu0 %vm656_vm7, %v1736_v60 }
0x182b   :  { %2561 = vmatpush3.bf16.msra.mxu0 %v2558_v42 }
0x182c   :  { %2563 = vmatprep.subr.bf16.mxu0 %v2562_v46 }
0x182f   :  { %2565 = vmatpush3.bf16.msra.mxu0 %v2562_v46 }
0x18fd   :  { %v1805_v61 = vpop.f32.mrb[18].mxu0 }
0x18fe   :  { %v1810_v63 = vrot.slane %v1805_v61, 2  ;;  %v1842_v0 = vadd.f32 %v1805_v61, %v2882_v29  ;;  %v2432_v4 = vpop.f32.mrb[19].mxu0  ;;  %v1849_v5 = vadd.f32 %v1805_v61, %v2884_v30  ;;  %v1819_v7 = vadd.f32 %v1805_v61, %v2889_v38  ;;  %v2062_v61 = vld [vmem:[%s3207_s3 + $0x90] sm:$0xff] }
0x18ff   :  { %v2064_v4 = vld [vmem:[%s3207_s3 + $0xa0] sm:$0xff] }
0x1900   :  { %v1812_v8 = vadd.f32 %v2880_v28, %v1810_v63  ;;  %1851 = vrot.lane.b32.xlu0 %v1849_v5, %s2732_s9  ;;  %v1821_v9 = vrot.slane %v1819_v7, 2  ;;  %v2194_v10 = vmul.f32 -1.442695, %v1842_v0  ;;  %v2063_v63 = vld [vmem:[%s3207_s3 + $0x98] sm:$0xff]  ;;  %v2065_v5 = vld [vmem:[%s3207_s3 + $0xa8] sm:$0xff] }
0x1901   :  { %v2574_v0 = vpack.c.bf16 %v2063_v63, %v2062_v61  ;;  %v2578_v7 = vpack.c.bf16 %v2065_v5, %v2064_v4 }
0x1902   :  { %1822 = vrot.lane.b32.xlu1 %v1821_v9, %s2732_s9  ;;  %v2193_v11 = vmul.f32 -1.442695, %v1812_v8  ;;  %2711 = vpow2.f32 %v2194_v10  ;;  %v2066_v8 = vld [vmem:[%s3207_s3 + $0xb0] sm:$0xff]  ;;  %v2067_v9 = vld [vmem:[%s3207_s3 + $0xb8] sm:$0xff] }
0x1903   :  { %v2582_v10 = vpack.c.bf16 %v2067_v9, %v2066_v8 }
0x1904   :  { %2713 = vpow2.f32 %v2193_v11  ;;  %v2068_v11 = vld [vmem:[%s3207_s3 + $0xc0] sm:$0xff] }
0x190c   :  { %v2712_v12 = vpop.eup %2711 }
0x190d   :  { %v1846_v14 = vadd.f32 1.0, %v2712_v12  ;;  %v2069_v12 = vld [vmem:[%s3207_s3 + $0xc8] sm:$0xff] }
0x190e   :  { %v2714_v13 = vpop.eup %2713 }
0x190f   :  { %v1816_v15 = vadd.f32 1.0, %v2714_v13  ;;  %2715 = vrcp.f32 %v1846_v14  ;;  %v2586_v13 = vpack.c.bf16 %v2069_v12, %v2068_v11  ;;  %v2070_v14 = vld [vmem:[%s3207_s3 + $0xd0] sm:$0xff] }
0x1911   :  { %2717 = vrcp.f32 %v1816_v15  ;;  %v2071_v15 = vld [vmem:[%s3207_s3 + $0xd8] sm:$0xff] }
0x1919   :  { %v2716_v30 = vpop.eup %2715 }
0x191b   :  { %v2718_v21 = vpop.eup %2717 }
0x191c   :  { %v1832_v35 = vsub.f32 1.0, %v2718_v21 }
0x1972   :  { %v1852_v18 = vpop.permute.xlu0 %1851 }
0x1973   :  { %v1854_v38 = vmul.f32 %v2716_v30, %v1852_v18 }
0x1974   :  { %v1823_v22 = vpop.permute.xlu1 %1822 }
0x1975   :  { %v1825_v23 = vmul.f32 %v2718_v21, %v1823_v22  ;;  %1856 = vrot.lane.b32.xlu0 %v1854_v38, %s2730_s30  ;;  %v2073_v22 = vld [vmem:[%s3207_s3 + $0xe8] sm:$0xff] }
0x1977   :  { %1827 = vrot.lane.b32.xlu1 %v1825_v23, %s2730_s30 }
0x19e7   :  { %v1857_v24 = vpop.permute.xlu0 %1856 }
0x19e8   :  { %v1859_v25 = vadd.f32 %v1857_v24, %v2882_v29  ;;  %v1867_v29 = vrot.slane %v1719_v53, 2  ;;  %v2197_v24 = vld [vmem:[%s3207_s3 + $0x120] ss:$0 sm:$0xff] }
0x19e9   :  { %v1828_v27 = vpop.permute.xlu1 %1827 }
0x19ea   :  { %2719 = vtanh.f32 %v1859_v25  ;;  %v1830_v31 = vadd.f32 %v2880_v28, %v1828_v27  ;;  %v1861_v28 = vsub.f32 1.0, %v2716_v30 }
0x19ec   :  { %2721 = vtanh.f32 %v1830_v31 }
0x19f4   :  { %v2720_v32 = vpop.eup %2719 }
0x19f5   :  { %1863 = vrot.lane.b32.xlu0 %v2720_v32, %s2728_s2 }
0x19f6   :  { %v2722_v33 = vpop.eup %2721 }
0x19f7   :  { %1834 = vrot.lane.b32.xlu1 %v2722_v33, %s2728_s2 }
0x19f9   :  { %961 = vrot.lane.b32.xlu0 %v2931_v54, %s2733_s10 }
0x19fb   :  { %806 = vrot.lane.b32.xlu1 %v2900_v62, %s2733_s10  ;;  %v1869_v62 = vmul.f32 %v2716_v30, %v1867_v29  ;;  %v2590_v30 = vpack.c.bf16 %v2071_v15, %v2070_v14  ;;  %v2200_v29 = vld [vmem:[%s3207_s3 + $0x128] ss:$0 sm:$0xff] }
0x19fd   :  { %1269 = vrot.lane.b32.xlu0 %v2992_v26, %s2733_s10 }
0x19ff   :  { %1116 = vrot.lane.b32.xlu1 %v2961_v43, %s2733_s10  ;;  %v1840_v43 = vmul.f32 %v2718_v21, %v1838_v34  ;;  %v2072_v21 = vld [vmem:[%s3207_s3 + $0xe0] sm:$0xff] }
0x1a00   :  { %v2594_v23 = vpack.c.bf16 %v2073_v22, %v2072_v21 }
0x1a01   :  { %1573 = vrot.lane.b32.xlu0 %v3049_v1, %s2733_s10 }
0x1a03   :  { %1420 = vrot.lane.b32.xlu1 %v3019_v17, %s2733_s10  ;;  %v1881_v17 = vld [vmem:[%s3207_s3 + $0x100] sm:$0xff] }
0x1a04   :  { %2437 = vmatprep.mubr.msk.f32.mxu1 %vm181_vm2, %v1881_v17 }
0x1a07   :  { %1726 = vrot.lane.b32.xlu1 %v1719_v53, %s2733_s10  ;;  %v1882_v53 = vld [vmem:[%s3207_s3 + $0x108] sm:$0xff] }
0x1a67   :  { %v1864_v54 = vpop.permute.xlu0 %1863 }
0x1a68   :  { %v1866_v16 = vmul.f32 %v1864_v54, %v1861_v28 }
0x1a69   :  { %v1835_v26 = vpop.permute.xlu1 %1834 }
0x1a6a   :  { %v1870_v2 = vadd.f32 %v1869_v62, %v1866_v16  ;;  %v1837_v3 = vmul.f32 %v1835_v26, %v1832_v35 }
0x1a6b   :  { %v962_v19 = vpop.permute.xlu0 %961 }
0x1a6c   :  { %v1841_v1 = vadd.f32 %v1840_v43, %v1837_v3  ;;  %965 = vst.msk [vmem:[#allocation2 + $0x8] sm:$0x30] %vm964_vm11, %v962_v19  ;;  %1877 = vrot.lane.b32.xlu1 %v1870_v2, %s2733_s10 }
0x1a6d   :  { %1724 = vst.msk [vmem:[#allocation2 + $0x8] sm:$0x30] %vm1113_vm9, %v3076_v57  ;;  %v807_v36 = vpop.permute.xlu1 %806  ;;  %v2060_v57 = vld [vmem:[%s3207_s3 + $0x80] sm:$0xff] }
0x1a6e   :  { %810 = vst.msk [vmem:[#allocation2 + $0x8] sm:$0xc0] %vm809_vm12, %v807_v36  ;;  %1872 = vrot.lane.b32.xlu0 %v1841_v1, %s2728_s2  ;;  %v2570_v60 = vpack.c.bf16 %v2061_v59, %v2060_v57 }
0x1a6f   :  { %v1270_v37 = vpop.permute.xlu0 %1269 }
0x1a70   :  { %1273 = vst.msk [vmem:[#allocation2 + $0x8] sm:$0x3] %vm1272_vm13, %v1270_v37 }
0x1a71   :  { %1418 = vst.msk [vmem:[#allocation2 + $0x8] sm:$0x3] %vm803_vm6, %v3025_v20  ;;  %v1117_v45 = vpop.permute.xlu1 %1116 }
0x1a72   :  { %1120 = vst.msk [vmem:[#allocation2 + $0x8] sm:$0xc] %vm1119_vm14, %v1117_v45 }
0x1a73   :  { %1571 = vst.msk [vmem:[#allocation2 + $0x8] sm:$0xc] %vm958_vm8, %v3054_v6  ;;  %v1574_v47 = vpop.permute.xlu0 %1573 }
0x1a74   :  { %1576 = vst.msk [vmem:[#allocation2] sm:$0x30] %vm964_vm11, %v1574_v47 }
0x1a75   :  { %v1421_v48 = vpop.permute.xlu1 %1420 }
0x1a76   :  { %1423 = vst.msk [vmem:[#allocation2] sm:$0xc0] %vm809_vm12, %v1421_v48 }
0x1a79   :  { %v1727_v49 = vpop.permute.xlu1 %1726 }
0x1a7a   :  { %1729 = vst.msk [vmem:[#allocation2] sm:$0xc] %vm1119_vm14, %v1727_v49 }
0x1ade   :  { %v1878_v20 = vpop.permute.xlu1 %1877 }
0x1adf   :  { %1880 = vst.msk [vmem:[#allocation2] sm:$0x3] %vm1272_vm13, %v1878_v20 }
0x1ae0   :  { %v1873_v50 = vpop.permute.xlu0 %1872 }
0x1ae1   :  { %1875 = vst.msk [vmem:[#allocation2 + $0x8] sm:$0xc0] %vm1266_vm10, %v1873_v50 }
0x1ae6   :  { %v1883_v51 = vld [vmem:[#allocation2] sm:$0xff] }
0x1ae8   :  { %v1884_v6 = vld [vmem:[#allocation2 + $0x8] sm:$0xff] }
0x1ae9   :  { %v2554_v52 = vpack.c.bf16 %v1884_v6, %v1883_v51 }
0x1aeb   :  { %2555 = vmatprep.subr.bf16.mxu1 %v2554_v52 }
0x1aec   :  { %2557 = vmatpush3.bf16.msra.mxu1 %v2554_v52 }
0x1aed   :  { %2567 = vmatprep.subr.bf16.mxu1 %v2566_v58 }
0x1aef   :  { %2438 = vmatmul.mubr.msk.f32.vlgmr.msra.gmra.mrb[10].mxu1 %vm181_vm2, %v1882_v53 }
0x1af0   :  { %2569 = vmatpush3.bf16.msra.mxu1 %v2566_v58 }
0x1af1   :  { %2571 = vmatprep.subr.bf16.mxu1 %v2570_v60 }
0x1af4   :  { %2573 = vmatpush3.bf16.msra.mxu1 %v2570_v60 }
0x1af5   :  { %2575 = vmatprep.subr.bf16.mxu1 %v2574_v0 }
0x1af8   :  { %2577 = vmatpush3.bf16.msra.mxu1 %v2574_v0 }
0x1af9   :  { %2579 = vmatprep.subr.bf16.mxu1 %v2578_v7 }
0x1afc   :  { %2581 = vmatpush3.bf16.msra.mxu1 %v2578_v7 }
0x1afd   :  { %2583 = vmatprep.subr.bf16.mxu1 %v2582_v10 }
0x1b00   :  { %2585 = vmatpush3.bf16.msra.mxu1 %v2582_v10 }
0x1b01   :  { %2587 = vmatprep.subr.bf16.mxu1 %v2586_v13 }
0x1b04   :  { %2589 = vmatpush3.bf16.msra.mxu1 %v2586_v13 }
0x1b05   :  { %2591 = vmatprep.subr.bf16.mxu1 %v2590_v30 }
0x1b08   :  { %2593 = vmatpush3.bf16.msra.mxu1 %v2590_v30 }
0x1b09   :  { %2595 = vmatprep.subr.bf16.mxu1 %v2594_v23 }
0x1b0c   :  { %2597 = vmatpush3.bf16.msra.mxu1 %v2594_v23 }
0x1bc2   :  { %v2439_v18 = vpop.f32.mrb[10].mxu1 }
0x1bc3   :  { %v1957_v38 = vpop.f32.mrb[11].mxu1 }
0x1bc4   :  { %2448 = vmatprep.mubr.msk.f32.mxu0 %vm656_vm7, %v1957_v38 }
0x1bc5   :  { %2449 = vmatmul.mubr.msk.f32.vlgmr.msra.gmra.mrb[20].mxu0 %vm656_vm7, %v2439_v18 }
0x1c98   :  { %v2450_v25 = vpop.f32.mrb[20].mxu0 }
0x1c99   :  { %v2053_v27 = vadd.f32 %v2450_v25, %v2197_v24  ;;  %v2047_v31 = vpop.f32.mrb[21].mxu0 }
0x1c9a   :  { %v2048_v32 = vadd.f32 %v2197_v24, %v2047_v31 }
0x1c9b   :  { %v2057_v28 = vmax.f32 %v2053_v27, 0.0 }
0x1c9c   :  { %v2056_v33 = vmax.f32 %v2048_v32, 0.0 }
0x1c9e   :  { %2483 = vmatprep.mubr.f32.mxu1 %v2056_v33 }
0x1c9f   :  { %2484 = vmatmul.mubr.f32.vlgmr.msra.gmra.mrb[12].mxu1 %v2057_v28 }
0x1d72   :  { %v2485_v54 = vpop.f32.mrb[12].mxu1 }
0x1d73   :  { %v2151_v34 = vadd.f32 %v2485_v54, %v2200_v29  ;;  %v2145_v62 = vpop.f32.mrb[13].mxu1 }
0x1d74   :  { %v2146_v16 = vadd.f32 %v2200_v29, %v2145_v62 }
0x1d75   :  { %2155 = vst [vmem:[%s3210_s4 + $0x8] sm:$0xff] %v2151_v34 }
0x1d76   :  { %2154 = vst [vmem:[%s3210_s4] sm:$0xff] %v2146_v16 }

</bundles_post_ra>
